<compile_context>
chip_gen: v7x
topology: tpu7x:2x2x1
jax: 0.10.0
libtpu: 0.0.40
codegen_flags: <defaults>
</compile_context>

<pallas_src>
import jax
import jax.numpy as jnp
import numpy as np
from jax import lax
from jax.experimental import pallas as pl
from jax.experimental.pallas import tpu as pltpu

NEG_SLOPE = 0.2            # F.leaky_relu(..., negative_slope=0.2) in the module
F_PAD = 128                # all feature dims zero-padded to one lane width
G_PAD = 8                  # pooled-graph rows padded to a full sublane group
VMEM_LIMIT_BYTES = 32 * 1024 * 1024


def _lrelu(v):
    return jnp.where(v > 0, v, NEG_SLOPE * v)


# ---------------------------------------------------------------------------
# Fused forward:
#   h1 = lrelu(Â @ X  @ W1 + b1)       (padded rows masked to 0)
#   h2 = lrelu(Â @ h1 @ W2 + b2)       (padded rows masked to 0)
#   out = lrelu((P @ h2) @ Wl1 + bl1) @ Wl2 + bl2
# ---------------------------------------------------------------------------
def make_fused_gcn_kernel(n_valid: int, n_pad: int):
    def kernel(adj_ref, x_ref, w1_ref, b1_ref, w2_ref, b2_ref,
               pool_ref, wl1_ref, bl1_ref, wl2_ref, bl2_ref, out_ref):
        bf = jnp.bfloat16
        adj = adj_ref[...]                                     # (N_PAD, N_PAD) bf16

        # Row-validity mask: padded node rows get bias + lrelu garbage from the
        # feature matmul; zero them so nothing propagates.
        rows = lax.broadcasted_iota(jnp.int32, (n_pad, 1), 0)
        valid = rows < n_valid

        # conv1 + leaky_relu(0.2)
        agg1 = jnp.dot(adj, x_ref[...], preferred_element_type=jnp.float32)
        h1 = _lrelu(jnp.dot(agg1.astype(bf), w1_ref[...],
                            preferred_element_type=jnp.float32) + b1_ref[...])
        h1 = jnp.where(valid, h1, 0.0).astype(bf)

        # conv2 + leaky_relu(0.2)
        agg2 = jnp.dot(adj, h1, preferred_element_type=jnp.float32)
        h2 = _lrelu(jnp.dot(agg2.astype(bf), w2_ref[...],
                            preferred_element_type=jnp.float32) + b2_ref[...])
        h2 = jnp.where(valid, h2, 0.0).astype(bf)

        # global_add_pool + lin1 + leaky_relu + dropout(identity) + lin2
        pooled = jnp.dot(pool_ref[...], h2, preferred_element_type=jnp.float32)
        z = _lrelu(jnp.dot(pooled.astype(bf), wl1_ref[...],
                           preferred_element_type=jnp.float32) + bl1_ref[...])
        # TODO(synk): F.dropout(p=0.5, training=True) not implemented; eval identity.
        out_ref[...] = (jnp.dot(z.astype(bf), wl2_ref[...],
                                preferred_element_type=jnp.float32)
                        + bl2_ref[...])
    return kernel


def gcn_forward_fused(adj, x, pool, w1, b1, w2, b2, wl1, bl1, wl2, bl2,
                      *, n_valid):
    n = adj.shape[0]
    f = x.shape[1]
    g = pool.shape[0]

    # Everything fetched exactly once; honest cost hint for XLA's scheduler.
    flops = (2 * n * n * f) * 2 + (2 * n * f * f) * 2 \
        + 2 * g * n * f + (2 * g * f * f) * 2
    bytes_accessed = (adj.size + x.size + pool.size
                      + w1.size + w2.size + wl1.size + wl2.size) * 2 \
        + (b1.size + b2.size + bl1.size + bl2.size + g * f) * 4

    full2d = lambda shape: pl.BlockSpec(shape, lambda i: (0, 0))

    return pl.pallas_call(
        make_fused_gcn_kernel(n_valid, n),
        out_shape=jax.ShapeDtypeStruct((g, f), jnp.float32),
        grid_spec=pltpu.PrefetchScalarGridSpec(
            num_scalar_prefetch=0,
            grid=(1,),
            in_specs=[
                full2d((n, n)),        # Â
                full2d((n, f)),        # X
                full2d((f, f)),        # W1
                full2d((1, f)),        # b1
                full2d((f, f)),        # W2
                full2d((1, f)),        # b2
                full2d((g, n)),        # pooling matrix P
                full2d((f, f)),        # Wl1
                full2d((1, f)),        # bl1
                full2d((f, f)),        # Wl2
                full2d((1, f)),        # bl2
            ],
            out_specs=full2d((g, f)),
        ),
        compiler_params=pltpu.CompilerParams(
            dimension_semantics=("arbitrary",),
            vmem_limit_bytes=VMEM_LIMIT_BYTES),
        cost_estimate=pl.CostEstimate(flops=int(flops), transcendentals=0,
                                      bytes_accessed=int(bytes_accessed)),
    )(adj, x, w1, b1, w2, b2, pool, wl1, bl1, wl2, bl2)


# ---------------------------------------------------------------------------
# References (pure JAX)
# ---------------------------------------------------------------------------
def _reference_bf16(x, adj_norm, pool, p):
    """Precision-matched mirror of the kernel (bf16 MXU operands, f32 acc)."""
    bf = jnp.bfloat16

    def lrelu(v):
        return jnp.where(v > 0, v, NEG_SLOPE * v)

    def mm(a, b):
        return jnp.dot(a.astype(bf), b.astype(bf),
                       preferred_element_type=jnp.float32)

    def layer(h, w, b):
        agg = mm(adj_norm, h)
        return lrelu(mm(agg, w) + b).astype(bf).astype(jnp.float32)

    h1 = layer(x, p["w1"], p["b1"])
    h2 = layer(h1, p["w2"], p["b2"])
    pooled = mm(pool, h2)
    z = lrelu(mm(pooled, p["wl1"]) + p["bl1"])
    return mm(z, p["wl2"]) + p["bl2"]


def _reference_f32(x, adj_norm, pool, p):
    """Full-f32 module semantics (loose sanity check)."""
    def lrelu(v):
        return jnp.where(v > 0, v, NEG_SLOPE * v)
    h1 = lrelu(adj_norm @ (x @ p["w1"]) + p["b1"])
    h2 = lrelu(adj_norm @ (h1 @ p["w2"]) + p["b2"])
    pooled = pool @ h2
    z = lrelu(pooled @ p["wl1"] + p["bl1"])
    return z @ p["wl2"] + p["bl2"]


def _pad(a, shape):
    out = np.zeros(shape, np.float32)
    a = np.asarray(a, np.float32)
    out[tuple(slice(0, s) for s in a.shape)] = a
    return out


if __name__ == "__main__":
    # Problem sizes consistent with the module: input_dim=16, hidden 32 -> 8 -> 2.
    D_IN, H1, H2, OUT = 16, 32, 8, 2
    NODES_PER_GRAPH, G = 120, 2
    N = NODES_PER_GRAPH * G                       # 240 nodes total
    N_PAD = ((N + 127) // 128) * 128              # 256

    key = jax.random.PRNGKey(0)
    ks = jax.random.split(key, 16)

    def init(k, shape, scale=0.2):
        return (scale * jax.random.normal(k, shape)).astype(jnp.float32)

    # Parameters at true sizes; weights pre-transposed to [in, out].
    params = {
        "w1": init(ks[0], (D_IN, H1)), "b1": init(ks[1], (1, H1)),
        "w2": init(ks[2], (H1, H2)),   "b2": init(ks[3], (1, H2)),
        "wl1": init(ks[4], (H2, H2)),  "bl1": init(ks[5], (1, H2)),
        "wl2": init(ks[6], (H2, OUT)), "bl2": init(ks[7], (1, OUT)),
    }

    # Node features.
    x = init(ks[8], (N, D_IN), scale=1.0)

    # edge_index: undirected chain inside each graph.
    src, dst = [], []
    for base in (0, NODES_PER_GRAPH):
        for i in range(NODES_PER_GRAPH - 1):
            a, b = base + i, base + i + 1
            src += [a, b]
            dst += [b, a]
    edge_index = np.stack([np.array(src), np.array(dst)])   # [2, 476]

    # GCN normalization:  Â = D^-1/2 (A + I) D^-1/2  (torch_geometric defaults).
    adj_np = np.zeros((N, N), dtype=np.float32)
    adj_np[edge_index[1], edge_index[0]] = 1.0               # adj[i, j]: edge j -> i
    adj_np[np.arange(N), np.arange(N)] = 1.0                  # self loops
    deg = adj_np.sum(axis=1)
    dinv = 1.0 / np.sqrt(deg)
    adj_norm_np = dinv[:, None] * adj_np * dinv[None, :]

    # batch vector -> one-hot pooling matrix (global_add_pool).
    batch = np.concatenate([np.full(NODES_PER_GRAPH, g, np.int32) for g in range(G)])
    pool_np = np.zeros((G, N), dtype=np.float32)
    pool_np[batch, np.arange(N)] = 1.0

    # ---- pad to TPU-friendly shapes and cast MXU operands to bf16 ----
    # Note: adjacency stored in bf16 quantizes D^-1/2 products (~8 mantissa
    # bits); fine at this scale (checked below against the f32 module at 1e-1
    # and a bf16-matched reference at 1e-3).
    bf = jnp.bfloat16
    adj_p = jnp.asarray(_pad(adj_norm_np, (N_PAD, N_PAD))).astype(bf)
    x_p = jnp.asarray(_pad(x, (N_PAD, F_PAD))).astype(bf)
    pool_p = jnp.asarray(_pad(pool_np, (G_PAD, N_PAD))).astype(bf)

    w1_p = jnp.asarray(_pad(params["w1"], (F_PAD, F_PAD))).astype(bf)
    b1_p = jnp.asarray(_pad(params["b1"], (1, F_PAD)))
    w2_p = jnp.asarray(_pad(params["w2"], (F_PAD, F_PAD))).astype(bf)
    b2_p = jnp.asarray(_pad(params["b2"], (1, F_PAD)))
    wl1_p = jnp.asarray(_pad(params["wl1"], (F_PAD, F_PAD))).astype(bf)
    bl1_p = jnp.asarray(_pad(params["bl1"], (1, F_PAD)))
    wl2_p = jnp.asarray(_pad(params["wl2"], (F_PAD, F_PAD))).astype(bf)
    bl2_p = jnp.asarray(_pad(params["bl2"], (1, F_PAD)))

    @jax.jit
    def forward(adj_p, x_p, pool_p, w1_p, b1_p, w2_p, b2_p,
                wl1_p, bl1_p, wl2_p, bl2_p):
        out = gcn_forward_fused(adj_p, x_p, pool_p, w1_p, b1_p, w2_p, b2_p,
                                wl1_p, bl1_p, wl2_p, bl2_p, n_valid=N)
        return out[:G, :OUT]                      # drop sublane / lane padding

    logits = forward(adj_p, x_p, pool_p, w1_p, b1_p, w2_p, b2_p,
                     wl1_p, bl1_p, wl2_p, bl2_p)
    logits = jax.block_until_ready(logits)
    assert logits.shape == (G, OUT)

    # Correctness checks.
    xj = jnp.asarray(x)
    adj_j = jnp.asarray(adj_norm_np)
    pool_j = jnp.asarray(pool_np)
    ref_bf16 = _reference_bf16(xj, adj_j, pool_j, params)
    ref_f32 = _reference_f32(xj, adj_j, pool_j, params)
    np.testing.assert_allclose(np.asarray(logits), np.asarray(ref_bf16),
                               rtol=1e-3, atol=1e-3)
    np.testing.assert_allclose(np.asarray(logits), np.asarray(ref_f32),
                               rtol=1e-1, atol=1e-1)

    # Note: with prune=False the original forward never assigns `selected_nodes`
    # (NameError in PyTorch); only the logits are produced here.
    # TODO(synk): SimpleTanhAttn pruning path (prune=True) not implemented.
    selected_nodes = None

    print("KERNEL_OK")
</pallas_src>

<mosaic_0001>
module attributes {stable_mosaic.version = 11 : i64} {
  func.func @kernel(%arg0: i32, %arg1: memref<256x256xbf16, #tpu.memory_space<vmem>>, %arg2: memref<256x128xbf16, #tpu.memory_space<vmem>>, %arg3: memref<128x128xbf16, #tpu.memory_space<vmem>>, %arg4: memref<1x128xf32, #tpu.memory_space<vmem>>, %arg5: memref<128x128xbf16, #tpu.memory_space<vmem>>, %arg6: memref<1x128xf32, #tpu.memory_space<vmem>>, %arg7: memref<8x256xbf16, #tpu.memory_space<vmem>>, %arg8: memref<128x128xbf16, #tpu.memory_space<vmem>>, %arg9: memref<1x128xf32, #tpu.memory_space<vmem>>, %arg10: memref<128x128xbf16, #tpu.memory_space<vmem>>, %arg11: memref<1x128xf32, #tpu.memory_space<vmem>>, %arg12: memref<8x128xf32, #tpu.memory_space<vmem>>) attributes {dimension_semantics = [#tpu.dimension_semantics<arbitrary>], iteration_bounds = array<i64: 1>, scalar_prefetch = 0 : i64, scratch_operands = 0 : i64, tpu.core_type = #tpu.core_type<tc>, window_params = [{pipeline_mode = #tpu.pipeline_mode<synchronous>, transform_indices = @transform_0, window_bounds = array<i64: 256, 256>}, {pipeline_mode = #tpu.pipeline_mode<synchronous>, transform_indices = @transform_1, window_bounds = array<i64: 256, 128>}, {pipeline_mode = #tpu.pipeline_mode<synchronous>, transform_indices = @transform_2, window_bounds = array<i64: 128, 128>}, {pipeline_mode = #tpu.pipeline_mode<synchronous>, transform_indices = @transform_3, window_bounds = array<i64: 1, 128>}, {pipeline_mode = #tpu.pipeline_mode<synchronous>, transform_indices = @transform_4, window_bounds = array<i64: 128, 128>}, {pipeline_mode = #tpu.pipeline_mode<synchronous>, transform_indices = @transform_5, window_bounds = array<i64: 1, 128>}, {pipeline_mode = #tpu.pipeline_mode<synchronous>, transform_indices = @transform_6, window_bounds = array<i64: 8, 256>}, {pipeline_mode = #tpu.pipeline_mode<synchronous>, transform_indices = @transform_7, window_bounds = array<i64: 128, 128>}, {pipeline_mode = #tpu.pipeline_mode<synchronous>, transform_indices = @transform_8, window_bounds = array<i64: 1, 128>}, {pipeline_mode = #tpu.pipeline_mode<synchronous>, transform_indices = @transform_9, window_bounds = array<i64: 128, 128>}, {pipeline_mode = #tpu.pipeline_mode<synchronous>, transform_indices = @transform_10, window_bounds = array<i64: 1, 128>}, {pipeline_mode = #tpu.pipeline_mode<synchronous>, transform_indices = @transform_11, window_bounds = array<i64: 8, 128>}]} {
    %c0 = arith.constant 0 : index
    %c0_0 = arith.constant 0 : index
    %0 = vector.load %arg1[%c0, %c0_0] : memref<256x256xbf16, #tpu.memory_space<vmem>>, vector<256x256xbf16>
    %1 = tpu.iota {dimensions = array<i32: 0>} : vector<256x1xi32>
    %c240_i32 = arith.constant 240 : i32
    %2 = vector.broadcast %c240_i32 : i32 to vector<256x1xi32>
    %3 = arith.cmpi slt, %1, %2 : vector<256x1xi32>
    %c0_1 = arith.constant 0 : index
    %c0_2 = arith.constant 0 : index
    %4 = vector.load %arg2[%c0_1, %c0_2] : memref<256x128xbf16, #tpu.memory_space<vmem>>, vector<256x128xbf16>
    %cst = arith.constant dense<0.000000e+00> : vector<256x128xf32>
    %5 = tpu.matmul %0, %4, %cst {dimension_numbers = #tpu.dot_dimension_numbers<[1], [0], [0], [1], [0, 0, 1, 1], [], []>} : vector<256x256xbf16>, vector<256x128xbf16>, vector<256x128xf32> -> vector<256x128xf32>
    %6 = arith.truncf %5 : vector<256x128xf32> to vector<256x128xbf16>
    %c0_3 = arith.constant 0 : index
    %c0_4 = arith.constant 0 : index
    %7 = vector.load %arg3[%c0_3, %c0_4] : memref<128x128xbf16, #tpu.memory_space<vmem>>, vector<128x128xbf16>
    %cst_5 = arith.constant dense<0.000000e+00> : vector<256x128xf32>
    %8 = tpu.matmul %6, %7, %cst_5 {dimension_numbers = #tpu.dot_dimension_numbers<[1], [0], [0], [1], [0, 0, 1, 1], [], []>} : vector<256x128xbf16>, vector<128x128xbf16>, vector<256x128xf32> -> vector<256x128xf32>
    %c0_6 = arith.constant 0 : index
    %c0_7 = arith.constant 0 : index
    %9 = vector.load %arg4[%c0_6, %c0_7] : memref<1x128xf32, #tpu.memory_space<vmem>>, vector<1x128xf32>
    %10 = vector.broadcast %9 : vector<1x128xf32> to vector<256x128xf32>
    %11 = arith.addf %8, %10 : vector<256x128xf32>
    %cst_8 = arith.constant 0.000000e+00 : f32
    %12 = vector.broadcast %cst_8 : f32 to vector<256x128xf32>
    %13 = arith.cmpf ogt, %11, %12 : vector<256x128xf32>
    %cst_9 = arith.constant 2.000000e-01 : f32
    %14 = vector.broadcast %cst_9 : f32 to vector<256x128xf32>
    %15 = arith.mulf %14, %11 : vector<256x128xf32>
    %16 = arith.select %13, %11, %15 : vector<256x128xi1>, vector<256x128xf32>
    %cst_10 = arith.constant 0.000000e+00 : f32
    %17 = vector.shape_cast %3 : vector<256x1xi1> to vector<256x1xi1>
    %18 = vector.broadcast %17 : vector<256x1xi1> to vector<256x128xi1>
    %19 = vector.broadcast %cst_10 : f32 to vector<256x128xf32>
    %20 = arith.select %18, %16, %19 : vector<256x128xi1>, vector<256x128xf32>
    %21 = arith.truncf %20 : vector<256x128xf32> to vector<256x128xbf16>
    %cst_11 = arith.constant dense<0.000000e+00> : vector<256x128xf32>
    %22 = tpu.matmul %0, %21, %cst_11 {dimension_numbers = #tpu.dot_dimension_numbers<[1], [0], [0], [1], [0, 0, 1, 1], [], []>} : vector<256x256xbf16>, vector<256x128xbf16>, vector<256x128xf32> -> vector<256x128xf32>
    %23 = arith.truncf %22 : vector<256x128xf32> to vector<256x128xbf16>
    %c0_12 = arith.constant 0 : index
    %c0_13 = arith.constant 0 : index
    %24 = vector.load %arg5[%c0_12, %c0_13] : memref<128x128xbf16, #tpu.memory_space<vmem>>, vector<128x128xbf16>
    %cst_14 = arith.constant dense<0.000000e+00> : vector<256x128xf32>
    %25 = tpu.matmul %23, %24, %cst_14 {dimension_numbers = #tpu.dot_dimension_numbers<[1], [0], [0], [1], [0, 0, 1, 1], [], []>} : vector<256x128xbf16>, vector<128x128xbf16>, vector<256x128xf32> -> vector<256x128xf32>
    %c0_15 = arith.constant 0 : index
    %c0_16 = arith.constant 0 : index
    %26 = vector.load %arg6[%c0_15, %c0_16] : memref<1x128xf32, #tpu.memory_space<vmem>>, vector<1x128xf32>
    %27 = vector.broadcast %26 : vector<1x128xf32> to vector<256x128xf32>
    %28 = arith.addf %25, %27 : vector<256x128xf32>
    %cst_17 = arith.constant 0.000000e+00 : f32
    %29 = vector.broadcast %cst_17 : f32 to vector<256x128xf32>
    %30 = arith.cmpf ogt, %28, %29 : vector<256x128xf32>
    %cst_18 = arith.constant 2.000000e-01 : f32
    %31 = vector.broadcast %cst_18 : f32 to vector<256x128xf32>
    %32 = arith.mulf %31, %28 : vector<256x128xf32>
    %33 = arith.select %30, %28, %32 : vector<256x128xi1>, vector<256x128xf32>
    %cst_19 = arith.constant 0.000000e+00 : f32
    %34 = vector.shape_cast %3 : vector<256x1xi1> to vector<256x1xi1>
    %35 = vector.broadcast %34 : vector<256x1xi1> to vector<256x128xi1>
    %36 = vector.broadcast %cst_19 : f32 to vector<256x128xf32>
    %37 = arith.select %35, %33, %36 : vector<256x128xi1>, vector<256x128xf32>
    %38 = arith.truncf %37 : vector<256x128xf32> to vector<256x128xbf16>
    %c0_20 = arith.constant 0 : index
    %c0_21 = arith.constant 0 : index
    %39 = vector.load %arg7[%c0_20, %c0_21] : memref<8x256xbf16, #tpu.memory_space<vmem>>, vector<8x256xbf16>
    %cst_22 = arith.constant dense<0.000000e+00> : vector<8x128xf32>
    %40 = tpu.matmul %39, %38, %cst_22 {dimension_numbers = #tpu.dot_dimension_numbers<[1], [0], [0], [1], [0, 0, 1, 1], [], []>} : vector<8x256xbf16>, vector<256x128xbf16>, vector<8x128xf32> -> vector<8x128xf32>
    %41 = arith.truncf %40 : vector<8x128xf32> to vector<8x128xbf16>
    %c0_23 = arith.constant 0 : index
    %c0_24 = arith.constant 0 : index
    %42 = vector.load %arg8[%c0_23, %c0_24] : memref<128x128xbf16, #tpu.memory_space<vmem>>, vector<128x128xbf16>
    %cst_25 = arith.constant dense<0.000000e+00> : vector<8x128xf32>
    %43 = tpu.matmul %41, %42, %cst_25 {dimension_numbers = #tpu.dot_dimension_numbers<[1], [0], [0], [1], [0, 0, 1, 1], [], []>} : vector<8x128xbf16>, vector<128x128xbf16>, vector<8x128xf32> -> vector<8x128xf32>
    %c0_26 = arith.constant 0 : index
    %c0_27 = arith.constant 0 : index
    %44 = vector.load %arg9[%c0_26, %c0_27] : memref<1x128xf32, #tpu.memory_space<vmem>>, vector<1x128xf32>
    %45 = vector.broadcast %44 : vector<1x128xf32> to vector<8x128xf32>
    %46 = arith.addf %43, %45 : vector<8x128xf32>
    %cst_28 = arith.constant 0.000000e+00 : f32
    %47 = vector.broadcast %cst_28 : f32 to vector<8x128xf32>
    %48 = arith.cmpf ogt, %46, %47 : vector<8x128xf32>
    %cst_29 = arith.constant 2.000000e-01 : f32
    %49 = vector.broadcast %cst_29 : f32 to vector<8x128xf32>
    %50 = arith.mulf %49, %46 : vector<8x128xf32>
    %51 = arith.select %48, %46, %50 : vector<8x128xi1>, vector<8x128xf32>
    %52 = arith.truncf %51 : vector<8x128xf32> to vector<8x128xbf16>
    %c0_30 = arith.constant 0 : index
    %c0_31 = arith.constant 0 : index
    %53 = vector.load %arg10[%c0_30, %c0_31] : memref<128x128xbf16, #tpu.memory_space<vmem>>, vector<128x128xbf16>
    %cst_32 = arith.constant dense<0.000000e+00> : vector<8x128xf32>
    %54 = tpu.matmul %52, %53, %cst_32 {dimension_numbers = #tpu.dot_dimension_numbers<[1], [0], [0], [1], [0, 0, 1, 1], [], []>} : vector<8x128xbf16>, vector<128x128xbf16>, vector<8x128xf32> -> vector<8x128xf32>
    %c0_33 = arith.constant 0 : index
    %c0_34 = arith.constant 0 : index
    %55 = vector.load %arg11[%c0_33, %c0_34] : memref<1x128xf32, #tpu.memory_space<vmem>>, vector<1x128xf32>
    %56 = vector.broadcast %55 : vector<1x128xf32> to vector<8x128xf32>
    %57 = arith.addf %54, %56 : vector<8x128xf32>
    %c0_35 = arith.constant 0 : index
    %c0_36 = arith.constant 0 : index
    %58 = vector.load %arg12[%c0_35, %c0_36] : memref<8x128xf32, #tpu.memory_space<vmem>>, vector<8x128xf32>
    tpu.vector_store %arg12[%c0_35, %c0_36], %57 {strides = array<i32>} : memref<8x128xf32, #tpu.memory_space<vmem>>, vector<8x128xf32>,
    return
  }
  func.func @transform_0(%arg0: i32) -> (i32, i32) {
    %c0_i32 = arith.constant 0 : i32
    %c0_i32_0 = arith.constant 0 : i32
    %c0_i32_1 = arith.constant 0 : i32
    return %c0_i32, %c0_i32_0 : i32, i32
  }
  func.func @transform_1(%arg0: i32) -> (i32, i32) {
    %c0_i32 = arith.constant 0 : i32
    %c0_i32_0 = arith.constant 0 : i32
    %c0_i32_1 = arith.constant 0 : i32
    return %c0_i32, %c0_i32_0 : i32, i32
  }
  func.func @transform_2(%arg0: i32) -> (i32, i32) {
    %c0_i32 = arith.constant 0 : i32
    %c0_i32_0 = arith.constant 0 : i32
    %c0_i32_1 = arith.constant 0 : i32
    return %c0_i32, %c0_i32_0 : i32, i32
  }
  func.func @transform_3(%arg0: i32) -> (i32, i32) {
    %c0_i32 = arith.constant 0 : i32
    %c0_i32_0 = arith.constant 0 : i32
    %c0_i32_1 = arith.constant 0 : i32
    return %c0_i32, %c0_i32_0 : i32, i32
  }
  func.func @transform_4(%arg0: i32) -> (i32, i32) {
    %c0_i32 = arith.constant 0 : i32
    %c0_i32_0 = arith.constant 0 : i32
    %c0_i32_1 = arith.constant 0 : i32
    return %c0_i32, %c0_i32_0 : i32, i32
  }
  func.func @transform_5(%arg0: i32) -> (i32, i32) {
    %c0_i32 = arith.constant 0 : i32
    %c0_i32_0 = arith.constant 0 : i32
    %c0_i32_1 = arith.constant 0 : i32
    return %c0_i32, %c0_i32_0 : i32, i32
  }
  func.func @transform_6(%arg0: i32) -> (i32, i32) {
    %c0_i32 = arith.constant 0 : i32
    %c0_i32_0 = arith.constant 0 : i32
    %c0_i32_1 = arith.constant 0 : i32
    return %c0_i32, %c0_i32_0 : i32, i32
  }
  func.func @transform_7(%arg0: i32) -> (i32, i32) {
    %c0_i32 = arith.constant 0 : i32
    %c0_i32_0 = arith.constant 0 : i32
    %c0_i32_1 = arith.constant 0 : i32
    return %c0_i32, %c0_i32_0 : i32, i32
  }
  func.func @transform_8(%arg0: i32) -> (i32, i32) {
    %c0_i32 = arith.constant 0 : i32
    %c0_i32_0 = arith.constant 0 : i32
    %c0_i32_1 = arith.constant 0 : i32
    return %c0_i32, %c0_i32_0 : i32, i32
  }
  func.func @transform_9(%arg0: i32) -> (i32, i32) {
    %c0_i32 = arith.constant 0 : i32
    %c0_i32_0 = arith.constant 0 : i32
    %c0_i32_1 = arith.constant 0 : i32
    return %c0_i32, %c0_i32_0 : i32, i32
  }
  func.func @transform_10(%arg0: i32) -> (i32, i32) {
    %c0_i32 = arith.constant 0 : i32
    %c0_i32_0 = arith.constant 0 : i32
    %c0_i32_1 = arith.constant 0 : i32
    return %c0_i32, %c0_i32_0 : i32, i32
  }
  func.func @transform_11(%arg0: i32) -> (i32, i32) {
    %c0_i32 = arith.constant 0 : i32
    %c0_i32_0 = arith.constant 0 : i32
    %c0_i32_1 = arith.constant 0 : i32
    return %c0_i32, %c0_i32_0 : i32, i32
  }
}

</mosaic_0001>

<bundles_post_ra>
// kernel: forward.1
= control target key start
LH: loop header
LB: loop body
LE: loop exit
PB: predicated region body
PF: predicated region fallthrough
CT: control target
= control target key end

     0   :  { %16 = vsyncpa [#allocation3], 0  ;;  %s3079_s0 = inlined_call_operand.hbm [shape: bf16[256,256], index: 0, kind: input, shape index: {}]   ;;  %s3080_s1 = inlined_call_operand.hbm [shape: bf16[256,128], index: 1, kind: input, shape index: {}]   ;;  %s3081_s2 = inlined_call_operand.hbm [shape: bf16[128,128], index: 2, kind: input, shape index: {}]   ;;  %s3082_s3 = inlined_call_operand.vmem [shape: f32[1,128], index: 3, kind: input, shape index: {}]   ;;  %s3083_s4 = inlined_call_operand.hbm [shape: bf16[128,128], index: 4, kind: input, shape index: {}]   ;;  %s3084_s5 = inlined_call_operand.vmem [shape: f32[1,128], index: 5, kind: input, shape index: {}]   ;;  %s3085_s6 = inlined_call_operand.hbm [shape: bf16[8,256], index: 6, kind: input, shape index: {}]   ;;  %s3086_s7 = inlined_call_operand.hbm [shape: bf16[128,128], index: 7, kind: input, shape index: {}]   ;;  %s3087_s8 = inlined_call_operand.vmem [shape: f32[1,128], index: 8, kind: input, shape index: {}]   ;;  %s3088_s9 = inlined_call_operand.hbm [shape: bf16[128,128], index: 9, kind: input, shape index: {}]   ;;  %s3089_s10 = inlined_call_operand.vmem [shape: f32[1,128], index: 10, kind: input, shape index: {}]   ;;  %s3090_s11 = inlined_call_operand.vmem [shape: f32[8,128], index: 11, kind: output, shape index: {}]  }
   0x1   :  { %17 = vsyncpa [#allocation5], 0 }
   0x2   :  { %18 = vsyncpa [#allocation8], 0 }
   0x3   :  { %19 = vsyncpa [#allocation11], 0  ;;  %s2645_s17 = smov [#allocation4]   ;;  %s2483_s21 = scalar_lea.hbm %s3080_s1, 2048 }
   0x4   :  { %s37_s18 = sshll.u32 %s2645_s17, 4  ;;  %p2484_p0 = scmp.ne.s32.totalorder %s3080_s1, %s2483_s21  ;;  %s38_s18 = int_to_ptr.vmem [resolvable:$true] %s37_s18 }
   0x5   :  { %p2487_p1 = scmp.lt.u32.totalorder %s2483_s21, %s3080_s1 }
   0x7   :  { %p2489_p2 = pnand %p2487_p1, %p2484_p0 }
   0x9   :  { %2492 = shalt.err (!%p2489_p2)
}
   0xa   :  { %s2493_s26 = scalar_lea.vmem %s38_s18, 2048  ;;  %p2498_p4 = scmp.lt.s32.totalorder %s38_s18, %s38_s18 }
   0xb   :  { %p2494_p3 = scmp.ne.s32.totalorder %s38_s18, %s2493_s26  ;;  %p2499_p5 = scmp.lt.s32.totalorder %s2493_s26, %s2493_s26 }
   0xd   :  { %p2500_p6 = por %p2499_p5, %p2498_p4 }
   0xf   :  { %p2501_p7 = pnand %p2500_p6, %p2494_p3 }
  0x11   :  { %2504 = shalt.err (!%p2501_p7)
}
  0x12   :  { %s2646_s27 = smov 64   ;;  %s2647_s28 = smov 4  }
  0x13   :  { %43 = dma.hbm_to_vmem [thread:$0]  %s3080_s1, 2048, %s38_s18, [#allocation5], %s2646_s27, %s2646_s27, %s2647_s28  }
  0x14   :  { %s2648_s12 = smov [#allocation7]   ;;  %s2649_s14 = smov [#allocation10]  }
  0x15   :  { %s63_s13 = sshll.u32 %s2648_s12, 4  ;;  %s87_s15 = sshll.u32 %s2649_s14, 4  ;;  %s64_s13 = int_to_ptr.vmem [resolvable:$true] %s63_s13  ;;  %s88_s15 = int_to_ptr.vmem [resolvable:$true] %s87_s15 }
  0x16   :  { %s2505_s19 = scalar_lea.hbm %s3083_s4, 1024 }
  0x17   :  { %p2506_p8 = scmp.ne.s32.totalorder %s3083_s4, %s2505_s19  ;;  %p2509_p9 = scmp.lt.u32.totalorder %s2505_s19, %s3083_s4 }
  0x19   :  { %p2511_p10 = pnand %p2509_p9, %p2506_p8 }
  0x1b   :  { %2514 = shalt.err (!%p2511_p10)
}
  0x1c   :  { %s2515_s1 = scalar_lea.vmem %s64_s13, 1024  ;;  %p2520_p12 = scmp.lt.s32.totalorder %s64_s13, %s64_s13 }
  0x1d   :  { %p2516_p11 = scmp.ne.s32.totalorder %s64_s13, %s2515_s1  ;;  %p2521_p13 = scmp.lt.s32.totalorder %s2515_s1, %s2515_s1 }
  0x1f   :  { %p2522_p0 = por %p2521_p13, %p2520_p12 }
  0x21   :  { %p2523_p1 = pnand %p2522_p0, %p2516_p11 }
  0x23   :  { %2526 = shalt.err (!%p2523_p1)
}
  0x24   :  { %69 = dma.hbm_to_vmem [thread:$0]  %s3083_s4, 1024, %s64_s13, [#allocation8], %s2646_s27, %s2646_s27, %s2647_s28  }
  0x25   :  { %s2527_s29 = scalar_lea.hbm %s3086_s7, 1024 }
  0x26   :  { %p2528_p2 = scmp.ne.s32.totalorder %s3086_s7, %s2527_s29  ;;  %p2531_p3 = scmp.lt.u32.totalorder %s2527_s29, %s3086_s7 }
  0x28   :  { %p2533_p4 = pnand %p2531_p3, %p2528_p2 }
  0x2a   :  { %2536 = shalt.err (!%p2533_p4)
}
  0x2b   :  { %s2537_s17 = scalar_lea.vmem %s88_s15, 1024  ;;  %p2542_p6 = scmp.lt.s32.totalorder %s88_s15, %s88_s15 }
  0x2c   :  { %p2538_p5 = scmp.ne.s32.totalorder %s88_s15, %s2537_s17  ;;  %p2543_p7 = scmp.lt.s32.totalorder %s2537_s17, %s2537_s17 }
  0x2e   :  { %p2544_p8 = por %p2543_p7, %p2542_p6 }
  0x30   :  { %p2545_p9 = pnand %p2544_p8, %p2538_p5 }
  0x32   :  { %2548 = shalt.err (!%p2545_p9)
}
  0x33   :  { %93 = dma.hbm_to_vmem [thread:$0]  %s3086_s7, 1024, %s88_s15, [#allocation11], %s2646_s27, %s2646_s27, %s2647_s28  }
  0x34   :  { %s2650_s19 = smov [#allocation2]   ;;  %s2549_s23 = scalar_lea.hbm %s3079_s0, 4096 }
  0x35   :  { %s25_s20 = sshll.u32 %s2650_s19, 4  ;;  %p2550_p10 = scmp.ne.s32.totalorder %s3079_s0, %s2549_s23  ;;  %s26_s20 = int_to_ptr.vmem [resolvable:$true] %s25_s20 }
  0x36   :  { %p2553_p11 = scmp.lt.u32.totalorder %s2549_s23, %s3079_s0 }
  0x38   :  { %p2555_p12 = pnand %p2553_p11, %p2550_p10 }
  0x3a   :  { %2558 = shalt.err (!%p2555_p12)
}
  0x3b   :  { %s2559_s26 = scalar_lea.vmem %s26_s20, 4096  ;;  %p2564_p0 = scmp.lt.s32.totalorder %s26_s20, %s26_s20 }
  0x3c   :  { %p2560_p13 = scmp.ne.s32.totalorder %s26_s20, %s2559_s26  ;;  %p2565_p1 = scmp.lt.s32.totalorder %s2559_s26, %s2559_s26 }
  0x3e   :  { %p2566_p2 = por %p2565_p1, %p2564_p0 }
  0x40   :  { %p2567_p3 = pnand %p2566_p2, %p2560_p13 }
  0x42   :  { %2570 = shalt.err (!%p2567_p3)
}
  0x43   :  { %s2651_s7 = smov 128   ;;  %s2652_s15 = smov 8  }
  0x44   :  { %31 = dma.hbm_to_vmem [thread:$0]  %s3079_s0, 4096, %s26_s20, [#allocation3], %s2651_s7, %s2651_s7, %s2652_s15  }
  0x45   :  { %s2653_s12 = smov [#allocation6]   ;;  %s2654_s16 = smov [#allocation9]  }
  0x46   :  { %s49_s14 = sshll.u32 %s2653_s12, 4  ;;  %s78_s17 = sshll.u32 %s2654_s16, 4  ;;  %s50_s14 = int_to_ptr.vmem [resolvable:$true] %s49_s14  ;;  %s79_s17 = int_to_ptr.vmem [resolvable:$true] %s78_s17 }
  0x47   :  { %s2571_s19 = scalar_lea.hbm %s3081_s2, 1024 }
  0x48   :  { %p2572_p4 = scmp.ne.s32.totalorder %s3081_s2, %s2571_s19  ;;  %p2575_p5 = scmp.lt.u32.totalorder %s2571_s19, %s3081_s2 }
  0x4a   :  { %p2577_p6 = pnand %p2575_p5, %p2572_p4 }
  0x4c   :  { %2580 = shalt.err (!%p2577_p6)
}
  0x4d   :  { %s2581_s0 = scalar_lea.vmem %s50_s14, 1024  ;;  %p2586_p8 = scmp.lt.s32.totalorder %s50_s14, %s50_s14 }
  0x4e   :  { %p2582_p7 = scmp.ne.s32.totalorder %s50_s14, %s2581_s0  ;;  %p2587_p9 = scmp.lt.s32.totalorder %s2581_s0, %s2581_s0 }
  0x50   :  { %p2588_p10 = por %p2587_p9, %p2586_p8 }
  0x52   :  { %p2589_p11 = pnand %p2588_p10, %p2582_p7 }
  0x54   :  { %2592 = shalt.err (!%p2589_p11)
}
  0x55   :  { %55 = dma.hbm_to_vmem [thread:$0]  %s3081_s2, 1024, %s50_s14, [#allocation5], %s2646_s27, %s2646_s27, %s2647_s28  }
  0x56   :  { %s2593_s26 = scalar_lea.hbm %s3085_s6, 128 }
  0x57   :  { %p2594_p12 = scmp.ne.s32.totalorder %s3085_s6, %s2593_s26  ;;  %p2597_p13 = scmp.lt.u32.totalorder %s2593_s26, %s3085_s6 }
  0x59   :  { %p2599_p0 = pnand %p2597_p13, %p2594_p12 }
  0x5b   :  { %2602 = shalt.err (!%p2599_p0)
}
  0x5c   :  { %s2603_s12 = scalar_lea.vmem %s79_s17, 128  ;;  %p2608_p2 = scmp.lt.s32.totalorder %s79_s17, %s79_s17 }
  0x5d   :  { %p2604_p1 = scmp.ne.s32.totalorder %s79_s17, %s2603_s12  ;;  %p2609_p3 = scmp.lt.s32.totalorder %s2603_s12, %s2603_s12 }
  0x5f   :  { %p2610_p4 = por %p2609_p3, %p2608_p2 }
  0x61   :  { %p2611_p5 = pnand %p2610_p4, %p2604_p1 }
  0x63   :  { %2614 = shalt.err (!%p2611_p5)
}
  0x64   :  { %81 = dma.hbm_to_vmem [thread:$0]  %s3085_s6, 128, %s79_s17, [#allocation8]  }
  0x65   :  { %s2655_s16 = smov [#allocation12]   ;;  %s2615_s21 = scalar_lea.hbm %s3088_s9, 1024 }
  0x66   :  { %s101_s4 = sshll.u32 %s2655_s16, 4  ;;  %p2616_p6 = scmp.ne.s32.totalorder %s3088_s9, %s2615_s21  ;;  %s102_s4 = int_to_ptr.vmem [resolvable:$true] %s101_s4 }
  0x67   :  { %p2619_p7 = scmp.lt.u32.totalorder %s2615_s21, %s3088_s9 }
  0x69   :  { %p2621_p8 = pnand %p2619_p7, %p2616_p6 }
  0x6b   :  { %2624 = shalt.err (!%p2621_p8)
}
  0x6c   :  { %s2625_s20 = scalar_lea.vmem %s102_s4, 1024  ;;  %p2630_p10 = scmp.lt.s32.totalorder %s102_s4, %s102_s4 }
  0x6d   :  { %p2626_p9 = scmp.ne.s32.totalorder %s102_s4, %s2625_s20  ;;  %p2631_p11 = scmp.lt.s32.totalorder %s2625_s20, %s2625_s20 }
  0x6f   :  { %p2632_p12 = por %p2631_p11, %p2630_p10 }
  0x71   :  { %p2633_p13 = pnand %p2632_p12, %p2626_p9 }
  0x73   :  { %2636 = shalt.err (!%p2633_p13)
}
  0x74   :  { %107 = dma.hbm_to_vmem [thread:$0]  %s3088_s9, 1024, %s102_s4, [#allocation11], %s2646_s27, %s2646_s27, %s2647_s28  }
  0x75   :  { %2637 = dma.done.wait [#allocation3], 4096  }
  0x76   :  { %2638 = vsyncadd [#allocation3], 4294963200 }
  0x77   :  { %2639 = dma.done.wait [#allocation5], 3072  }
  0x78   :  { %2640 = vsyncadd [#allocation5], 4294964224 }
  0x79   :  { %2641 = dma.done.wait [#allocation8], 1152  }
  0x7a   :  { %2642 = vsyncadd [#allocation8], 4294966144 }
  0x7b   :  { %2643 = dma.done.wait [#allocation11], 2048  }
  0x7c   :  { %2644 = vsyncadd [#allocation11], 4294965248  ;;  %v2385_v0 = vld [vmem:[#allocation4 + $0x40] sm:$0xff]   ;;  %v2387_v2 = vld [vmem:[#allocation4 + $0x48] sm:$0xff]  }
  0x7d   :  { %v2386_v1 = vld [vmem:[#allocation4] sm:$0xff]   ;;  %2057 = vmatprep.subr.bf16.mxu0 %v2385_v0  ;;  %v2388_v3 = vld [vmem:[#allocation4 + $0x8] sm:$0xff]   ;;  %v2389_v4 = vld [vmem:[#allocation4 + $0x50] sm:$0xff]  }
  0x7e   :  { %2058 = vmatpush3.bf16.msra.mxu0 %v2386_v1  ;;  %v2390_v5 = vld [vmem:[#allocation4 + $0x10] sm:$0xff]   ;;  %v2391_v6 = vld [vmem:[#allocation4 + $0x58] sm:$0xff]   ;;  %v2393_v8 = vld [vmem:[#allocation4 + $0x60] sm:$0xff]  }
  0x7f   :  { %2059 = vmatprep.subr.bf16.mxu0 %v2387_v2  ;;  %v2392_v7 = vld [vmem:[#allocation4 + $0x18] sm:$0xff]   ;;  %v2394_v9 = vld [vmem:[#allocation4 + $0x20] sm:$0xff]   ;;  %v2395_v10 = vld [vmem:[#allocation4 + $0x68] sm:$0xff]  }
  0x80   :  { %v2818_v11 = vld [vmem:[#allocation2 + $0x4] ss:$8 sps:$4 sm:$0xff]   ;;  %v2397_v13 = vld [vmem:[#allocation4 + $0x70] sm:$0xff]   ;;  %v2399_v15 = vld [vmem:[#allocation4 + $0x78] sm:$0xff]  }
  0x81   :  { %v2396_v12 = vld [vmem:[#allocation4 + $0x28] sm:$0xff]   ;;  %549 = vmatprep.mubr.bf16.mxu0 %v2818_v11  ;;  %v2398_v14 = vld [vmem:[#allocation4 + $0x30] sm:$0xff]   ;;  %v2400_v16 = vld [vmem:[#allocation4 + $0x38] sm:$0xff]  }
  0x82   :  { %2060 = vmatpush3.bf16.msra.mxu0 %v2388_v3  ;;  %v2821_v17 = vld [vmem:[#allocation2] ss:$8 sps:$4 sm:$0xff]   ;;  %v2823_v18 = vld [vmem:[#allocation2 + $0x14] ss:$8 sps:$4 sm:$0xff]   ;;  %v2827_v19 = vld [vmem:[#allocation2 + $0x10] ss:$8 sps:$4 sm:$0xff]  }
  0x83   :  { %2061 = vmatprep.subr.bf16.mxu0 %v2389_v4  ;;  %v2829_v20 = vld [vmem:[#allocation2 + $0x24] ss:$8 sps:$4 sm:$0xff]   ;;  %v2451_v23 = vld [vmem:[#allocation6 + $0x10] sm:$0xff]   ;;  %v2833_v24 = vld [vmem:[#allocation2 + $0x20] ss:$8 sps:$4 sm:$0xff]  }
  0x84   :  { %v2449_v21 = vld [vmem:[#allocation6] sm:$0xff]   ;;  %v2450_v22 = vld [vmem:[#allocation6 + $0x8] sm:$0xff]   ;;  %v2452_v25 = vld [vmem:[#allocation6 + $0x18] sm:$0xff]  }
  0x85   :  { %2235 = vmatprep.subr.bf16.mxu1 %v2449_v21  ;;  %v2835_v26 = vld [vmem:[#allocation2 + $0x34] ss:$8 sps:$4 sm:$0xff]   ;;  %v2839_v27 = vld [vmem:[#allocation2 + $0x30] ss:$8 sps:$4 sm:$0xff]   ;;  %v2841_v28 = vld [vmem:[#allocation2 + $0x44] ss:$8 sps:$4 sm:$0xff]  }
  0x86   :  { %2062 = vmatpush3.bf16.msra.mxu0 %v2390_v5  ;;  %2236 = vmatpush3.bf16.msra.mxu1 %v2449_v21  ;;  %v2845_v29 = vld [vmem:[#allocation2 + $0x40] ss:$8 sps:$4 sm:$0xff]   ;;  %v2847_v30 = vld [vmem:[#allocation2 + $0x54] ss:$8 sps:$4 sm:$0xff]   ;;  %v2851_v31 = vld [vmem:[#allocation2 + $0x50] ss:$8 sps:$4 sm:$0xff]  }
  0x87   :  { %2063 = vmatprep.subr.bf16.mxu0 %v2391_v6  ;;  %2237 = vmatprep.subr.bf16.mxu1 %v2450_v22  ;;  %v2853_v32 = vld [vmem:[#allocation2 + $0x64] ss:$8 sps:$4 sm:$0xff]   ;;  %v2857_v33 = vld [vmem:[#allocation2 + $0x60] ss:$8 sps:$4 sm:$0xff]   ;;  %v2859_v34 = vld [vmem:[#allocation2 + $0x74] ss:$8 sps:$4 sm:$0xff]  }
  0x88   :  { %v2863_v35 = vld [vmem:[#allocation2 + $0x70] ss:$8 sps:$4 sm:$0xff]   ;;  %v2865_v36 = vld [vmem:[#allocation2 + $0x84] ss:$8 sps:$4 sm:$0xff]   ;;  %v2869_v37 = vld [vmem:[#allocation2 + $0x80] ss:$8 sps:$4 sm:$0xff]  }
  0x89   :  { %v2871_v38 = vld [vmem:[#allocation2 + $0x94] ss:$8 sps:$4 sm:$0xff]   ;;  %v2875_v39 = vld [vmem:[#allocation2 + $0x90] ss:$8 sps:$4 sm:$0xff]   ;;  %v2877_v40 = vld [vmem:[#allocation2 + $0xa4] ss:$8 sps:$4 sm:$0xff]  }
  0x8a   :  { %2064 = vmatpush3.bf16.msra.mxu0 %v2392_v7  ;;  %2238 = vmatpush3.bf16.msra.mxu1 %v2450_v22  ;;  %v2881_v41 = vld [vmem:[#allocation2 + $0xa0] ss:$8 sps:$4 sm:$0xff]   ;;  %v2883_v42 = vld [vmem:[#allocation2 + $0xb4] ss:$8 sps:$4 sm:$0xff]   ;;  %v2887_v44 = vld [vmem:[#allocation2 + $0xb0] ss:$8 sps:$4 sm:$0xff]  }
  0x8b   :  { %2065 = vmatprep.subr.bf16.mxu0 %v2393_v8  ;;  %2239 = vmatprep.subr.bf16.mxu1 %v2451_v23  ;;  %v2453_v43 = vld [vmem:[#allocation6 + $0x20] sm:$0xff]   ;;  %v2454_v46 = vld [vmem:[#allocation6 + $0x28] sm:$0xff]   ;;  %v2455_v47 = vld [vmem:[#allocation6 + $0x30] sm:$0xff]  }
  0x8c   :  { %v2889_v45 = vld [vmem:[#allocation2 + $0xc4] ss:$8 sps:$4 sm:$0xff]   ;;  %v2893_v48 = vld [vmem:[#allocation2 + $0xc0] ss:$8 sps:$4 sm:$0xff]   ;;  %v2895_v49 = vld [vmem:[#allocation2 + $0xd4] ss:$8 sps:$4 sm:$0xff]  }
  0x8d   :  { %v2456_v50 = vld [vmem:[#allocation6 + $0x38] sm:$0xff]   ;;  %v2901_v52 = vld [vmem:[#allocation2 + $0xe4] ss:$8 sps:$4 sm:$0xff]   ;;  %v2905_v53 = vld [vmem:[#allocation2 + $0xe0] ss:$8 sps:$4 sm:$0xff]  }
  0x8e   :  { %2066 = vmatpush3.bf16.msra.mxu0 %v2394_v9  ;;  %2240 = vmatpush3.bf16.msra.mxu1 %v2451_v23  ;;  %v2899_v51 = vld [vmem:[#allocation2 + $0xd0] ss:$8 sps:$4 sm:$0xff]   ;;  %v2907_v54 = vld [vmem:[#allocation2 + $0xf4] ss:$8 sps:$4 sm:$0xff]  }
  0x8f   :  { %2067 = vmatprep.subr.bf16.mxu0 %v2395_v10  ;;  %2241 = vmatprep.subr.bf16.mxu1 %v2452_v25  ;;  %v2911_v55 = vld [vmem:[#allocation2 + $0xf0] ss:$8 sps:$4 sm:$0xff]  }
  0x92   :  { %2068 = vmatpush3.bf16.msra.mxu0 %v2396_v12  ;;  %2242 = vmatpush3.bf16.msra.mxu1 %v2452_v25 }
  0x93   :  { %2069 = vmatprep.subr.bf16.mxu0 %v2397_v13  ;;  %2243 = vmatprep.subr.bf16.mxu1 %v2453_v43 }
  0x96   :  { %2070 = vmatpush3.bf16.msra.mxu0 %v2398_v14  ;;  %2244 = vmatpush3.bf16.msra.mxu1 %v2453_v43 }
  0x97   :  { %2071 = vmatprep.subr.bf16.mxu0 %v2399_v15  ;;  %2245 = vmatprep.subr.bf16.mxu1 %v2454_v46 }
  0x9a   :  { %2072 = vmatpush3.bf16.msra.mxu0 %v2400_v16  ;;  %2246 = vmatpush3.bf16.msra.mxu1 %v2454_v46 }
  0x9b   :  { %2247 = vmatprep.subr.bf16.mxu1 %v2455_v47 }
  0x9d   :  { %550 = vmatmul.mubr.bf16.vlgmr.msra.gmra.mrb[0].mxu0 %v2821_v17 }
  0x9e   :  { %557 = vmatprep.mubr.bf16.mxu0 %v2823_v18  ;;  %2248 = vmatpush3.bf16.msra.mxu1 %v2455_v47 }
  0x9f   :  { %2249 = vmatprep.subr.bf16.mxu1 %v2456_v50 }
  0xa2   :  { %2250 = vmatpush3.bf16.msra.mxu1 %v2456_v50 }
  0xa5   :  { %558 = vmatmul.mubr.bf16.gmra.mrb[4].mxu0 %v2827_v19 }
  0xa6   :  { %565 = vmatprep.mubr.bf16.mxu0 %v2829_v20 }
  0xad   :  { %566 = vmatmul.mubr.bf16.gmra.mrb[8].mxu0 %v2833_v24 }
  0xae   :  { %573 = vmatprep.mubr.bf16.mxu0 %v2835_v26 }
  0xb5   :  { %574 = vmatmul.mubr.bf16.gmra.mrb[12].mxu0 %v2839_v27 }
  0xb6   :  { %581 = vmatprep.mubr.bf16.mxu0 %v2841_v28 }
  0xbd   :  { %582 = vmatmul.mubr.bf16.gmra.mrb[16].mxu0 %v2845_v29 }
  0xbe   :  { %589 = vmatprep.mubr.bf16.mxu0 %v2847_v30 }
  0xc5   :  { %590 = vmatmul.mubr.bf16.gmra.mrb[20].mxu0 %v2851_v31 }
  0xc6   :  { %597 = vmatprep.mubr.bf16.mxu0 %v2853_v32 }
  0xcd   :  { %598 = vmatmul.mubr.bf16.gmra.mrb[24].mxu0 %v2857_v33 }
  0xce   :  { %605 = vmatprep.mubr.bf16.mxu0 %v2859_v34 }
  0xd5   :  { %606 = vmatmul.mubr.bf16.gmra.mrb[28].mxu0 %v2863_v35 }
  0xd6   :  { %613 = vmatprep.mubr.bf16.mxu0 %v2865_v36 }
  0xdd   :  { %614 = vmatmul.mubr.bf16.gmra.mrb[32].mxu0 %v2869_v37 }
  0xde   :  { %621 = vmatprep.mubr.bf16.mxu0 %v2871_v38 }
  0xe5   :  { %622 = vmatmul.mubr.bf16.gmra.mrb[36].mxu0 %v2875_v39 }
  0xe6   :  { %629 = vmatprep.mubr.bf16.mxu0 %v2877_v40 }
  0xed   :  { %630 = vmatmul.mubr.bf16.gmra.mrb[40].mxu0 %v2881_v41 }
  0xee   :  { %637 = vmatprep.mubr.bf16.mxu0 %v2883_v42 }
  0xf5   :  { %638 = vmatmul.mubr.bf16.gmra.mrb[44].mxu0 %v2887_v44 }
  0xf6   :  { %645 = vmatprep.mubr.bf16.mxu0 %v2889_v45 }
  0xfd   :  { %646 = vmatmul.mubr.bf16.gmra.mrb[48].mxu0 %v2893_v48 }
  0xfe   :  { %653 = vmatprep.mubr.bf16.mxu0 %v2895_v49 }
 0x105   :  { %654 = vmatmul.mubr.bf16.gmra.mrb[52].mxu0 %v2899_v51 }
 0x106   :  { %661 = vmatprep.mubr.bf16.mxu0 %v2901_v52 }
 0x10d   :  { %662 = vmatmul.mubr.bf16.gmra.mrb[56].mxu0 %v2905_v53 }
 0x10e   :  { %669 = vmatprep.mubr.bf16.mxu0 %v2907_v54 }
 0x115   :  { %670 = vmatmul.mubr.bf16.gmra.mrb[60].mxu0 %v2911_v55 }
 0x170   :  { %v2073_v56 = vpop.f32.mrb[0].mxu0 }
 0x171   :  { %v2074_v57 = vpop.f32.mrb[1].mxu0 }
 0x172   :  { %v2075_v58 = vadd.f32 %v2074_v57, %v2073_v56  ;;  %v2076_v59 = vpop.f32.mrb[2].mxu0 }
 0x173   :  { %v2077_v60 = vpop.f32.mrb[3].mxu0 }
 0x174   :  { %v2078_v61 = vadd.f32 %v2077_v60, %v2076_v59 }
 0x176   :  { %v678_v62 = vpack.c.bf16 %v2078_v61, %v2075_v58 }
 0x178   :  { %v2079_v63 = vpop.f32.mrb[4].mxu0  ;;  %2251 = vmatprep.mubr.bf16.mxu1 %v678_v62 }
 0x179   :  { %v2080_v0 = vpop.f32.mrb[5].mxu0 }
 0x17a   :  { %v2081_v1 = vadd.f32 %v2080_v0, %v2079_v63  ;;  %v2082_v2 = vpop.f32.mrb[6].mxu0 }
 0x17b   :  { %v2083_v3 = vpop.f32.mrb[7].mxu0 }
 0x17c   :  { %v2084_v4 = vadd.f32 %v2083_v3, %v2082_v2 }
 0x17e   :  { %v679_v5 = vpack.c.bf16 %v2084_v4, %v2081_v1 }
 0x180   :  { %v2085_v6 = vpop.f32.mrb[8].mxu0  ;;  %2252 = vmatmul.mubr.bf16.vlgmr.msra.gmra.mrb[0].mxu1 %v679_v5 }
 0x181   :  { %v2086_v7 = vpop.f32.mrb[9].mxu0 }
 0x182   :  { %v2087_v8 = vadd.f32 %v2086_v7, %v2085_v6  ;;  %v2088_v9 = vpop.f32.mrb[10].mxu0 }
 0x183   :  { %v2089_v10 = vpop.f32.mrb[11].mxu0 }
 0x184   :  { %v2090_v12 = vadd.f32 %v2089_v10, %v2088_v9 }
 0x186   :  { %v680_v13 = vpack.c.bf16 %v2090_v12, %v2087_v8 }
 0x188   :  { %v2091_v14 = vpop.f32.mrb[12].mxu0  ;;  %2255 = vmatprep.mubr.bf16.mxu1 %v680_v13 }
 0x189   :  { %v2092_v15 = vpop.f32.mrb[13].mxu0 }
 0x18a   :  { %v2093_v16 = vadd.f32 %v2092_v15, %v2091_v14  ;;  %v2094_v21 = vpop.f32.mrb[14].mxu0 }
 0x18b   :  { %v2095_v22 = vpop.f32.mrb[15].mxu0 }
 0x18c   :  { %v2096_v23 = vadd.f32 %v2095_v22, %v2094_v21 }
 0x18e   :  { %v681_v25 = vpack.c.bf16 %v2096_v23, %v2093_v16 }
 0x190   :  { %v2097_v43 = vpop.f32.mrb[16].mxu0  ;;  %2256 = vmatmul.mubr.bf16.gmra.mrb[4].mxu1 %v681_v25 }
 0x191   :  { %v2098_v46 = vpop.f32.mrb[17].mxu0 }
 0x192   :  { %v2099_v47 = vadd.f32 %v2098_v46, %v2097_v43  ;;  %v2100_v50 = vpop.f32.mrb[18].mxu0 }
 0x193   :  { %v2101_v56 = vpop.f32.mrb[19].mxu0 }
 0x194   :  { %v2102_v57 = vadd.f32 %v2101_v56, %v2100_v50 }
 0x196   :  { %v682_v58 = vpack.c.bf16 %v2102_v57, %v2099_v47 }
 0x198   :  { %v2103_v59 = vpop.f32.mrb[20].mxu0  ;;  %2259 = vmatprep.mubr.bf16.mxu1 %v682_v58 }
 0x199   :  { %v2104_v60 = vpop.f32.mrb[21].mxu0 }
 0x19a   :  { %v2105_v61 = vadd.f32 %v2104_v60, %v2103_v59  ;;  %v2106_v62 = vpop.f32.mrb[22].mxu0 }
 0x19b   :  { %v2107_v63 = vpop.f32.mrb[23].mxu0 }
 0x19c   :  { %v2108_v0 = vadd.f32 %v2107_v63, %v2106_v62 }
 0x19e   :  { %v683_v1 = vpack.c.bf16 %v2108_v0, %v2105_v61 }
 0x1a0   :  { %v2109_v2 = vpop.f32.mrb[24].mxu0  ;;  %2260 = vmatmul.mubr.bf16.gmra.mrb[8].mxu1 %v683_v1 }
 0x1a1   :  { %v2110_v3 = vpop.f32.mrb[25].mxu0 }
 0x1a2   :  { %v2111_v4 = vadd.f32 %v2110_v3, %v2109_v2  ;;  %v2112_v5 = vpop.f32.mrb[26].mxu0 }
 0x1a3   :  { %v2113_v6 = vpop.f32.mrb[27].mxu0 }
 0x1a4   :  { %v2114_v7 = vadd.f32 %v2113_v6, %v2112_v5 }
 0x1a6   :  { %v684_v8 = vpack.c.bf16 %v2114_v7, %v2111_v4 }
 0x1a8   :  { %v2115_v9 = vpop.f32.mrb[28].mxu0  ;;  %2263 = vmatprep.mubr.bf16.mxu1 %v684_v8 }
 0x1a9   :  { %v2116_v10 = vpop.f32.mrb[29].mxu0 }
 0x1aa   :  { %v2117_v12 = vadd.f32 %v2116_v10, %v2115_v9  ;;  %v2118_v13 = vpop.f32.mrb[30].mxu0 }
 0x1ab   :  { %v2119_v14 = vpop.f32.mrb[31].mxu0 }
 0x1ac   :  { %v2120_v15 = vadd.f32 %v2119_v14, %v2118_v13 }
 0x1ae   :  { %v685_v16 = vpack.c.bf16 %v2120_v15, %v2117_v12 }
 0x1b0   :  { %v2121_v21 = vpop.f32.mrb[32].mxu0  ;;  %2264 = vmatmul.mubr.bf16.gmra.mrb[12].mxu1 %v685_v16 }
 0x1b1   :  { %v2122_v22 = vpop.f32.mrb[33].mxu0 }
 0x1b2   :  { %v2123_v23 = vadd.f32 %v2122_v22, %v2121_v21  ;;  %v2124_v25 = vpop.f32.mrb[34].mxu0 }
 0x1b3   :  { %v2125_v43 = vpop.f32.mrb[35].mxu0 }
 0x1b4   :  { %v2126_v46 = vadd.f32 %v2125_v43, %v2124_v25 }
 0x1b6   :  { %v686_v47 = vpack.c.bf16 %v2126_v46, %v2123_v23 }
 0x1b8   :  { %v2127_v50 = vpop.f32.mrb[36].mxu0  ;;  %2267 = vmatprep.mubr.bf16.mxu1 %v686_v47 }
 0x1b9   :  { %v2128_v56 = vpop.f32.mrb[37].mxu0 }
 0x1ba   :  { %v2129_v57 = vadd.f32 %v2128_v56, %v2127_v50  ;;  %v2130_v58 = vpop.f32.mrb[38].mxu0 }
 0x1bb   :  { %v2131_v59 = vpop.f32.mrb[39].mxu0 }
 0x1bc   :  { %v2132_v60 = vadd.f32 %v2131_v59, %v2130_v58 }
 0x1be   :  { %v687_v61 = vpack.c.bf16 %v2132_v60, %v2129_v57  ;;  %v2656_v57 = vmov 0  }
 0x1bf   :  { %1134 = vmatprep.subr.bf16.mxu1 %v2656_v57 }
 0x1c0   :  { %v2133_v62 = vpop.f32.mrb[40].mxu0  ;;  %2268 = vmatmul.mubr.bf16.gmra.mrb[16].mxu1 %v687_v61 }
 0x1c1   :  { %v2134_v63 = vpop.f32.mrb[41].mxu0 }
 0x1c2   :  { %v2135_v0 = vadd.f32 %v2134_v63, %v2133_v62  ;;  %v2136_v1 = vpop.f32.mrb[42].mxu0 }
 0x1c3   :  { %v2137_v2 = vpop.f32.mrb[43].mxu0 }
 0x1c4   :  { %v2138_v3 = vadd.f32 %v2137_v2, %v2136_v1 }
 0x1c6   :  { %v688_v4 = vpack.c.bf16 %v2138_v3, %v2135_v0 }
 0x1c8   :  { %v2139_v5 = vpop.f32.mrb[44].mxu0  ;;  %2271 = vmatprep.mubr.bf16.mxu1 %v688_v4 }
 0x1c9   :  { %v2140_v6 = vpop.f32.mrb[45].mxu0 }
 0x1ca   :  { %v2141_v7 = vadd.f32 %v2140_v6, %v2139_v5  ;;  %v2142_v8 = vpop.f32.mrb[46].mxu0 }
 0x1cb   :  { %v2143_v9 = vpop.f32.mrb[47].mxu0 }
 0x1cc   :  { %v2144_v10 = vadd.f32 %v2143_v9, %v2142_v8  ;;  %v2919_v9 = vld [vmem:[%s3082_s3] ss:$0 sm:$0xff] }
 0x1ce   :  { %v689_v12 = vpack.c.bf16 %v2144_v10, %v2141_v7 }
 0x1d0   :  { %v2145_v13 = vpop.f32.mrb[48].mxu0  ;;  %2272 = vmatmul.mubr.bf16.gmra.mrb[20].mxu1 %v689_v12 }
 0x1d1   :  { %v2146_v14 = vpop.f32.mrb[49].mxu0 }
 0x1d2   :  { %v2147_v15 = vadd.f32 %v2146_v14, %v2145_v13  ;;  %v2148_v16 = vpop.f32.mrb[50].mxu0 }
 0x1d3   :  { %v2149_v21 = vpop.f32.mrb[51].mxu0 }
 0x1d4   :  { %v2150_v22 = vadd.f32 %v2149_v21, %v2148_v16 }
 0x1d6   :  { %v690_v23 = vpack.c.bf16 %v2150_v22, %v2147_v15 }
 0x1d8   :  { %v2151_v25 = vpop.f32.mrb[52].mxu0  ;;  %2275 = vmatprep.mubr.bf16.mxu1 %v690_v23 }
 0x1d9   :  { %v2152_v43 = vpop.f32.mrb[53].mxu0 }
 0x1da   :  { %v2153_v46 = vadd.f32 %v2152_v43, %v2151_v25  ;;  %v2154_v47 = vpop.f32.mrb[54].mxu0 }
 0x1db   :  { %v2155_v50 = vpop.f32.mrb[55].mxu0 }
 0x1dc   :  { %v2156_v56 = vadd.f32 %v2155_v50, %v2154_v47 }
 0x1de   :  { %v691_v58 = vpack.c.bf16 %v2156_v56, %v2153_v46 }
 0x1e0   :  { %v2157_v59 = vpop.f32.mrb[56].mxu0  ;;  %2276 = vmatmul.mubr.bf16.gmra.mrb[24].mxu1 %v691_v58 }
 0x1e1   :  { %v2158_v60 = vpop.f32.mrb[57].mxu0 }
 0x1e2   :  { %v2159_v61 = vadd.f32 %v2158_v60, %v2157_v59  ;;  %v2160_v62 = vpop.f32.mrb[58].mxu0 }
 0x1e3   :  { %v2161_v63 = vpop.f32.mrb[59].mxu0 }
 0x1e4   :  { %v2162_v0 = vadd.f32 %v2161_v63, %v2160_v62 }
 0x1e6   :  { %v692_v1 = vpack.c.bf16 %v2162_v0, %v2159_v61 }
 0x1e8   :  { %v2163_v2 = vpop.f32.mrb[60].mxu0  ;;  %2279 = vmatprep.mubr.bf16.mxu1 %v692_v1 }
 0x1e9   :  { %v2164_v3 = vpop.f32.mrb[61].mxu0 }
 0x1ea   :  { %v2165_v4 = vadd.f32 %v2164_v3, %v2163_v2  ;;  %v2166_v5 = vpop.f32.mrb[62].mxu0 }
 0x1eb   :  { %v2167_v6 = vpop.f32.mrb[63].mxu0 }
 0x1ec   :  { %v2168_v7 = vadd.f32 %v2167_v6, %v2166_v5 }
 0x1ee   :  { %v693_v8 = vpack.c.bf16 %v2168_v7, %v2165_v4 }
 0x1f0   :  { %2280 = vmatmul.mubr.bf16.gmra.mrb[28].mxu1 %v693_v8 }
 0x1f1   :  { %1166 = vmatprep.mubr.bf16.mxu1 %v2818_v11 }
 0x253   :  { %v2253_v10 = vpop.f32.mrb[0].mxu1 }
 0x254   :  { %v808_v12 = vadd.f32 %v2253_v10, %v2919_v9  ;;  %v799_v13 = vpop.f32.mrb[1].mxu1 }
 0x255   :  { %v800_v14 = vadd.f32 %v2919_v9, %v799_v13  ;;  %v2254_v15 = vpop.f32.mrb[2].mxu1 }
 0x256   :  { %v960_v16 = vmul.f32 0.2, %v808_v12  ;;  %v811_v21 = vadd.f32 %v2254_v15, %v2919_v9  ;;  %v802_v22 = vpop.f32.mrb[3].mxu1  ;;  %vm928_vm0 = vcmp.gt.f32.partialorder %v808_v12, 0.0 }
 0x257   :  { %v958_v23 = vmul.f32 0.2, %v800_v14  ;;  %v803_v11 = vadd.f32 %v2919_v9, %v802_v22  ;;  %vm926_vm1 = vcmp.gt.f32.partialorder %v800_v14, 0.0 }
 0x258   :  { %vm929_vm2 = vcmp.gt.f32.partialorder %v811_v21, 0.0  ;;  %v961_v25 = vmul.f32 0.2, %v811_v21  ;;  %v992_v46 = vsel %vm928_vm0, %v808_v12, %v960_v16 }
 0x259   :  { %vm927_vm3 = vcmp.gt.f32.partialorder %v803_v11, 0.0  ;;  %v959_v43 = vmul.f32 0.2, %v803_v11  ;;  %v990_v50 = vsel %vm926_vm1, %v800_v14, %v958_v23 }
 0x25a   :  { %v993_v47 = vsel %vm929_vm2, %v811_v21, %v961_v25 }
 0x25b   :  { %v1119_v56 = vpack.c.bf16 %v993_v47, %v992_v46  ;;  %v991_v58 = vsel %vm927_vm3, %v803_v11, %v959_v43 }
 0x25c   :  { %v1118_v59 = vpack.c.bf16 %v991_v58, %v990_v50 }
 0x25e   :  { %1135 = vmatpush1.bf16.msra.mxu1 %v1118_v59 }
 0x25f   :  { %1136 = vmatprep.subr.bf16.mxu1 %v2656_v57 }
 0x262   :  { %1137 = vmatpush1.bf16.msra.mxu1 %v1119_v56 }
 0x263   :  { %v2257_v60 = vpop.f32.mrb[4].mxu1  ;;  %1138 = vmatprep.subr.bf16.mxu1 %v2656_v57 }
 0x264   :  { %v824_v61 = vadd.f32 %v2257_v60, %v2919_v9  ;;  %v815_v62 = vpop.f32.mrb[5].mxu1 }
 0x265   :  { %v816_v63 = vadd.f32 %v2919_v9, %v815_v62  ;;  %v2258_v0 = vpop.f32.mrb[6].mxu1 }
 0x266   :  { %v964_v1 = vmul.f32 0.2, %v824_v61  ;;  %v827_v2 = vadd.f32 %v2258_v0, %v2919_v9  ;;  %v818_v3 = vpop.f32.mrb[7].mxu1  ;;  %vm932_vm4 = vcmp.gt.f32.partialorder %v824_v61, 0.0 }
 0x267   :  { %v962_v4 = vmul.f32 0.2, %v816_v63  ;;  %v819_v5 = vadd.f32 %v2919_v9, %v818_v3  ;;  %vm930_vm5 = vcmp.gt.f32.partialorder %v816_v63, 0.0 }
 0x268   :  { %vm933_vm6 = vcmp.gt.f32.partialorder %v827_v2, 0.0  ;;  %v965_v6 = vmul.f32 0.2, %v827_v2  ;;  %v996_v8 = vsel %vm932_vm4, %v824_v61, %v964_v1 }
 0x269   :  { %vm931_vm7 = vcmp.gt.f32.partialorder %v819_v5, 0.0  ;;  %v963_v7 = vmul.f32 0.2, %v819_v5  ;;  %v994_v12 = vsel %vm930_vm5, %v816_v63, %v962_v4 }
 0x26a   :  { %v997_v10 = vsel %vm933_vm6, %v827_v2, %v965_v6 }
 0x26b   :  { %v1121_v13 = vpack.c.bf16 %v997_v10, %v996_v8  ;;  %v995_v14 = vsel %vm931_vm7, %v819_v5, %v963_v7 }
 0x26c   :  { %v1120_v15 = vpack.c.bf16 %v995_v14, %v994_v12 }
 0x26e   :  { %1139 = vmatpush1.bf16.msra.mxu1 %v1120_v15 }
 0x26f   :  { %1140 = vmatprep.subr.bf16.mxu1 %v2656_v57 }
 0x272   :  { %1141 = vmatpush1.bf16.msra.mxu1 %v1121_v13 }
 0x273   :  { %v2261_v16 = vpop.f32.mrb[8].mxu1  ;;  %1142 = vmatprep.subr.bf16.mxu1 %v2656_v57 }
 0x274   :  { %v840_v21 = vadd.f32 %v2261_v16, %v2919_v9  ;;  %v831_v22 = vpop.f32.mrb[9].mxu1 }
 0x275   :  { %v832_v23 = vadd.f32 %v2919_v9, %v831_v22  ;;  %v2262_v11 = vpop.f32.mrb[10].mxu1 }
 0x276   :  { %v968_v25 = vmul.f32 0.2, %v840_v21  ;;  %v843_v43 = vadd.f32 %v2262_v11, %v2919_v9  ;;  %v834_v46 = vpop.f32.mrb[11].mxu1  ;;  %vm936_vm8 = vcmp.gt.f32.partialorder %v840_v21, 0.0 }
 0x277   :  { %v966_v47 = vmul.f32 0.2, %v832_v23  ;;  %v835_v50 = vadd.f32 %v2919_v9, %v834_v46  ;;  %vm934_vm9 = vcmp.gt.f32.partialorder %v832_v23, 0.0 }
 0x278   :  { %vm937_vm10 = vcmp.gt.f32.partialorder %v843_v43, 0.0  ;;  %v969_v56 = vmul.f32 0.2, %v843_v43  ;;  %v1000_v59 = vsel %vm936_vm8, %v840_v21, %v968_v25 }
 0x279   :  { %vm935_vm11 = vcmp.gt.f32.partialorder %v835_v50, 0.0  ;;  %v967_v58 = vmul.f32 0.2, %v835_v50  ;;  %v998_v61 = vsel %vm934_vm9, %v832_v23, %v966_v47 }
 0x27a   :  { %v1001_v60 = vsel %vm937_vm10, %v843_v43, %v969_v56 }
 0x27b   :  { %v1123_v62 = vpack.c.bf16 %v1001_v60, %v1000_v59  ;;  %v999_v63 = vsel %vm935_vm11, %v835_v50, %v967_v58 }
 0x27c   :  { %v1122_v0 = vpack.c.bf16 %v999_v63, %v998_v61 }
 0x27e   :  { %1143 = vmatpush1.bf16.msra.mxu1 %v1122_v0 }
 0x27f   :  { %1144 = vmatprep.subr.bf16.mxu1 %v2656_v57 }
 0x282   :  { %1145 = vmatpush1.bf16.msra.mxu1 %v1123_v62 }
 0x283   :  { %v2265_v1 = vpop.f32.mrb[12].mxu1  ;;  %1146 = vmatprep.subr.bf16.mxu1 %v2656_v57 }
 0x284   :  { %v856_v2 = vadd.f32 %v2265_v1, %v2919_v9  ;;  %v847_v3 = vpop.f32.mrb[13].mxu1 }
 0x285   :  { %v848_v4 = vadd.f32 %v2919_v9, %v847_v3  ;;  %v2266_v5 = vpop.f32.mrb[14].mxu1 }
 0x286   :  { %v972_v6 = vmul.f32 0.2, %v856_v2  ;;  %v859_v7 = vadd.f32 %v2266_v5, %v2919_v9  ;;  %v850_v8 = vpop.f32.mrb[15].mxu1  ;;  %vm940_vm12 = vcmp.gt.f32.partialorder %v856_v2, 0.0 }
 0x287   :  { %v970_v10 = vmul.f32 0.2, %v848_v4  ;;  %v851_v12 = vadd.f32 %v2919_v9, %v850_v8  ;;  %vm938_vm13 = vcmp.gt.f32.partialorder %v848_v4, 0.0 }
 0x288   :  { %vm941_vm14 = vcmp.gt.f32.partialorder %v859_v7, 0.0  ;;  %v973_v13 = vmul.f32 0.2, %v859_v7  ;;  %v1004_v15 = vsel %vm940_vm12, %v856_v2, %v972_v6 }
 0x289   :  { %vm939_vm15 = vcmp.gt.f32.partialorder %v851_v12, 0.0  ;;  %v971_v14 = vmul.f32 0.2, %v851_v12  ;;  %v1002_v21 = vsel %vm938_vm13, %v848_v4, %v970_v10 }
 0x28a   :  { %v1005_v16 = vsel %vm941_vm14, %v859_v7, %v973_v13 }
 0x28b   :  { %v1125_v22 = vpack.c.bf16 %v1005_v16, %v1004_v15  ;;  %v1003_v23 = vsel %vm939_vm15, %v851_v12, %v971_v14 }
 0x28c   :  { %v1124_v11 = vpack.c.bf16 %v1003_v23, %v1002_v21 }
 0x28e   :  { %1147 = vmatpush1.bf16.msra.mxu1 %v1124_v11 }
 0x28f   :  { %1148 = vmatprep.subr.bf16.mxu1 %v2656_v57 }
 0x292   :  { %1149 = vmatpush1.bf16.msra.mxu1 %v1125_v22 }
 0x293   :  { %v2269_v25 = vpop.f32.mrb[16].mxu1  ;;  %1150 = vmatprep.subr.bf16.mxu1 %v2656_v57 }
 0x294   :  { %v872_v43 = vadd.f32 %v2269_v25, %v2919_v9  ;;  %v863_v46 = vpop.f32.mrb[17].mxu1 }
 0x295   :  { %v864_v47 = vadd.f32 %v2919_v9, %v863_v46  ;;  %v2270_v50 = vpop.f32.mrb[18].mxu1 }
 0x296   :  { %v976_v56 = vmul.f32 0.2, %v872_v43  ;;  %v875_v58 = vadd.f32 %v2270_v50, %v2919_v9  ;;  %v866_v59 = vpop.f32.mrb[19].mxu1  ;;  %vm944_vm0 = vcmp.gt.f32.partialorder %v872_v43, 0.0 }
 0x297   :  { %v974_v60 = vmul.f32 0.2, %v864_v47  ;;  %v867_v61 = vadd.f32 %v2919_v9, %v866_v59  ;;  %vm942_vm1 = vcmp.gt.f32.partialorder %v864_v47, 0.0 }
 0x298   :  { %vm945_vm2 = vcmp.gt.f32.partialorder %v875_v58, 0.0  ;;  %v977_v62 = vmul.f32 0.2, %v875_v58  ;;  %v1008_v0 = vsel %vm944_vm0, %v872_v43, %v976_v56 }
 0x299   :  { %vm943_vm3 = vcmp.gt.f32.partialorder %v867_v61, 0.0  ;;  %v975_v63 = vmul.f32 0.2, %v867_v61  ;;  %v1006_v2 = vsel %vm942_vm1, %v864_v47, %v974_v60 }
 0x29a   :  { %v1009_v1 = vsel %vm945_vm2, %v875_v58, %v977_v62 }
 0x29b   :  { %v1127_v3 = vpack.c.bf16 %v1009_v1, %v1008_v0  ;;  %v1007_v4 = vsel %vm943_vm3, %v867_v61, %v975_v63 }
 0x29c   :  { %v1126_v5 = vpack.c.bf16 %v1007_v4, %v1006_v2 }
 0x29e   :  { %1151 = vmatpush1.bf16.msra.mxu1 %v1126_v5 }
 0x29f   :  { %1152 = vmatprep.subr.bf16.mxu1 %v2656_v57 }
 0x2a2   :  { %1153 = vmatpush1.bf16.msra.mxu1 %v1127_v3 }
 0x2a3   :  { %v2273_v6 = vpop.f32.mrb[20].mxu1  ;;  %1154 = vmatprep.subr.bf16.mxu1 %v2656_v57 }
 0x2a4   :  { %v888_v7 = vadd.f32 %v2273_v6, %v2919_v9  ;;  %v879_v8 = vpop.f32.mrb[21].mxu1 }
 0x2a5   :  { %v880_v10 = vadd.f32 %v2919_v9, %v879_v8  ;;  %v2274_v12 = vpop.f32.mrb[22].mxu1 }
 0x2a6   :  { %v980_v13 = vmul.f32 0.2, %v888_v7  ;;  %v891_v14 = vadd.f32 %v2274_v12, %v2919_v9  ;;  %v882_v15 = vpop.f32.mrb[23].mxu1  ;;  %vm948_vm4 = vcmp.gt.f32.partialorder %v888_v7, 0.0 }
 0x2a7   :  { %v978_v16 = vmul.f32 0.2, %v880_v10  ;;  %v883_v21 = vadd.f32 %v2919_v9, %v882_v15  ;;  %vm946_vm5 = vcmp.gt.f32.partialorder %v880_v10, 0.0 }
 0x2a8   :  { %vm949_vm6 = vcmp.gt.f32.partialorder %v891_v14, 0.0  ;;  %v981_v22 = vmul.f32 0.2, %v891_v14  ;;  %v1012_v11 = vsel %vm948_vm4, %v888_v7, %v980_v13 }
 0x2a9   :  { %vm947_vm7 = vcmp.gt.f32.partialorder %v883_v21, 0.0  ;;  %v979_v23 = vmul.f32 0.2, %v883_v21  ;;  %v1010_v43 = vsel %vm946_vm5, %v880_v10, %v978_v16 }
 0x2aa   :  { %v1013_v25 = vsel %vm949_vm6, %v891_v14, %v981_v22 }
 0x2ab   :  { %v1129_v46 = vpack.c.bf16 %v1013_v25, %v1012_v11  ;;  %v1011_v47 = vsel %vm947_vm7, %v883_v21, %v979_v23  ;;  %v2457_v25 = vld [vmem:[#allocation7] sm:$0xff]  }
 0x2ac   :  { %v1128_v50 = vpack.c.bf16 %v1011_v47, %v1010_v43  ;;  %v2458_v43 = vld [vmem:[#allocation7 + $0x8] sm:$0xff]   ;;  %2283 = vmatprep.subr.bf16.mxu0 %v2457_v25 }
 0x2ad   :  { %2284 = vmatpush3.bf16.msra.mxu0 %v2457_v25 }
 0x2ae   :  { %1155 = vmatpush1.bf16.msra.mxu1 %v1128_v50  ;;  %2285 = vmatprep.subr.bf16.mxu0 %v2458_v43 }
 0x2af   :  { %1156 = vmatprep.subr.bf16.mxu1 %v2656_v57 }
 0x2b1   :  { %2286 = vmatpush3.bf16.msra.mxu0 %v2458_v43 }
 0x2b2   :  { %1157 = vmatpush1.bf16.msra.mxu1 %v1129_v46 }
 0x2b3   :  { %v2277_v56 = vpop.f32.mrb[24].mxu1  ;;  %1158 = vmatprep.subr.bf16.mxu1 %v2656_v57 }
 0x2b4   :  { %v904_v58 = vadd.f32 %v2277_v56, %v2919_v9  ;;  %v895_v59 = vpop.f32.mrb[25].mxu1  ;;  %v2459_v56 = vld [vmem:[#allocation7 + $0x10] sm:$0xff]  }
 0x2b5   :  { %v896_v60 = vadd.f32 %v2919_v9, %v895_v59  ;;  %v2278_v61 = vpop.f32.mrb[26].mxu1  ;;  %2287 = vmatprep.subr.bf16.mxu0 %v2459_v56 }
 0x2b6   :  { %v984_v62 = vmul.f32 0.2, %v904_v58  ;;  %v907_v63 = vadd.f32 %v2278_v61, %v2919_v9  ;;  %v898_v0 = vpop.f32.mrb[27].mxu1  ;;  %vm952_vm8 = vcmp.gt.f32.partialorder %v904_v58, 0.0  ;;  %2288 = vmatpush3.bf16.msra.mxu0 %v2459_v56 }
 0x2b7   :  { %v982_v1 = vmul.f32 0.2, %v896_v60  ;;  %v899_v2 = vadd.f32 %v2919_v9, %v898_v0  ;;  %vm950_vm9 = vcmp.gt.f32.partialorder %v896_v60, 0.0 }
 0x2b8   :  { %vm953_vm10 = vcmp.gt.f32.partialorder %v907_v63, 0.0  ;;  %v985_v3 = vmul.f32 0.2, %v907_v63  ;;  %v1016_v5 = vsel %vm952_vm8, %v904_v58, %v984_v62  ;;  %v2460_v58 = vld [vmem:[#allocation7 + $0x18] sm:$0xff]  }
 0x2b9   :  { %vm951_vm11 = vcmp.gt.f32.partialorder %v899_v2, 0.0  ;;  %v983_v4 = vmul.f32 0.2, %v899_v2  ;;  %v1014_v7 = vsel %vm950_vm9, %v896_v60, %v982_v1  ;;  %2289 = vmatprep.subr.bf16.mxu0 %v2460_v58 }
 0x2ba   :  { %v1017_v6 = vsel %vm953_vm10, %v907_v63, %v985_v3  ;;  %2290 = vmatpush3.bf16.msra.mxu0 %v2460_v58 }
 0x2bb   :  { %v1131_v8 = vpack.c.bf16 %v1017_v6, %v1016_v5  ;;  %v1015_v10 = vsel %vm951_vm11, %v899_v2, %v983_v4 }
 0x2bc   :  { %v1130_v12 = vpack.c.bf16 %v1015_v10, %v1014_v7 }
 0x2be   :  { %1159 = vmatpush1.bf16.msra.mxu1 %v1130_v12 }
 0x2bf   :  { %1160 = vmatprep.subr.bf16.mxu1 %v2656_v57 }
 0x2c2   :  { %1161 = vmatpush1.bf16.msra.mxu1 %v1131_v8 }
 0x2c3   :  { %v2281_v13 = vpop.f32.mrb[28].mxu1  ;;  %1162 = vmatprep.subr.bf16.mxu1 %v2656_v57 }
 0x2c4   :  { %v911_v14 = vpop.f32.mrb[29].mxu1 }
 0x2c5   :  { %v912_v15 = vadd.f32 %v2919_v9, %v911_v14  ;;  %v2282_v16 = vpop.f32.mrb[30].mxu1 }
 0x2c6   :  { %v914_v21 = vpop.f32.mrb[31].mxu1 }
 0x2c7   :  { %v986_v22 = vmul.f32 0.2, %v912_v15  ;;  %v915_v23 = vadd.f32 %v2919_v9, %v914_v21  ;;  %vm954_vm12 = vcmp.gt.f32.partialorder %v912_v15, 0.0  ;;  %v2461_v9 = vld [vmem:[#allocation7 + $0x20] sm:$0xff]  }
 0x2c8   :  { %2291 = vmatprep.subr.bf16.mxu0 %v2461_v9 }
 0x2c9   :  { %vm955_vm13 = vcmp.gt.f32.partialorder %v915_v23, 0.0  ;;  %v987_v11 = vmul.f32 0.2, %v915_v23  ;;  %v1018_v46 = vsel %vm954_vm12, %v912_v15, %v986_v22  ;;  %2292 = vmatpush3.bf16.msra.mxu0 %v2461_v9 }
 0x2cb   :  { %v1019_v47 = vsel %vm955_vm13, %v915_v23, %v987_v11 }
 0x2cc   :  { %v1132_v50 = vpack.c.bf16 %v1019_v47, %v1018_v46 }
 0x2ce   :  { %1163 = vmatpush1.bf16.msra.mxu1 %v1132_v50 }
 0x2d1   :  { %1167 = vmatmul.mubr.bf16.vlgmr.msra.gmra.mrb[32].mxu1 %v2821_v17  ;;  %v2462_v17 = vld [vmem:[#allocation7 + $0x28] sm:$0xff]  }
 0x2d2   :  { %1174 = vmatprep.mubr.bf16.mxu1 %v2823_v18  ;;  %2293 = vmatprep.subr.bf16.mxu0 %v2462_v17  ;;  %v2463_v18 = vld [vmem:[#allocation7 + $0x30] sm:$0xff]  }
 0x2d3   :  { %2294 = vmatpush3.bf16.msra.mxu0 %v2462_v17 }
 0x2d4   :  { %2295 = vmatprep.subr.bf16.mxu0 %v2463_v18 }
 0x2d7   :  { %2296 = vmatpush3.bf16.msra.mxu0 %v2463_v18 }
 0x2d9   :  { %1175 = vmatmul.mubr.bf16.gmra.mrb[36].mxu1 %v2827_v19  ;;  %v2464_v19 = vld [vmem:[#allocation7 + $0x38] sm:$0xff]  }
 0x2da   :  { %1182 = vmatprep.mubr.bf16.mxu1 %v2829_v20  ;;  %2297 = vmatprep.subr.bf16.mxu0 %v2464_v19 }
 0x2db   :  { %2298 = vmatpush3.bf16.msra.mxu0 %v2464_v19 }
 0x2dc   :  { %1695 = vmatprep.subr.bf16.mxu0 %v2656_v57 }
 0x2e1   :  { %1183 = vmatmul.mubr.bf16.gmra.mrb[40].mxu1 %v2833_v24 }
 0x2e2   :  { %1190 = vmatprep.mubr.bf16.mxu1 %v2835_v26 }
 0x2e9   :  { %1191 = vmatmul.mubr.bf16.gmra.mrb[44].mxu1 %v2839_v27 }
 0x2ea   :  { %1198 = vmatprep.mubr.bf16.mxu1 %v2841_v28 }
 0x2f1   :  { %1199 = vmatmul.mubr.bf16.gmra.mrb[48].mxu1 %v2845_v29 }
 0x2f2   :  { %1206 = vmatprep.mubr.bf16.mxu1 %v2847_v30 }
 0x2f9   :  { %1207 = vmatmul.mubr.bf16.gmra.mrb[52].mxu1 %v2851_v31 }
 0x2fa   :  { %1214 = vmatprep.mubr.bf16.mxu1 %v2853_v32 }
 0x301   :  { %1215 = vmatmul.mubr.bf16.gmra.mrb[56].mxu1 %v2857_v33 }
 0x302   :  { %1222 = vmatprep.mubr.bf16.mxu1 %v2859_v34 }
 0x309   :  { %1223 = vmatmul.mubr.bf16.gmra.mrb[60].mxu1 %v2863_v35 }
 0x30a   :  { %1230 = vmatprep.mubr.bf16.mxu1 %v2865_v36 }
 0x311   :  { %1231 = vmatmul.mubr.bf16.gmra.mrb[64].mxu1 %v2869_v37 }
 0x312   :  { %1238 = vmatprep.mubr.bf16.mxu1 %v2871_v38 }
 0x319   :  { %1239 = vmatmul.mubr.bf16.gmra.mrb[68].mxu1 %v2875_v39 }
 0x31a   :  { %1246 = vmatprep.mubr.bf16.mxu1 %v2877_v40 }
 0x321   :  { %1247 = vmatmul.mubr.bf16.gmra.mrb[72].mxu1 %v2881_v41 }
 0x322   :  { %1254 = vmatprep.mubr.bf16.mxu1 %v2883_v42 }
 0x329   :  { %1255 = vmatmul.mubr.bf16.gmra.mrb[76].mxu1 %v2887_v44 }
 0x32a   :  { %1262 = vmatprep.mubr.bf16.mxu1 %v2889_v45 }
 0x331   :  { %1263 = vmatmul.mubr.bf16.gmra.mrb[80].mxu1 %v2893_v48 }
 0x332   :  { %1270 = vmatprep.mubr.bf16.mxu1 %v2895_v49 }
 0x339   :  { %1271 = vmatmul.mubr.bf16.gmra.mrb[84].mxu1 %v2899_v51 }
 0x33a   :  { %1278 = vmatprep.mubr.bf16.mxu1 %v2901_v52 }
 0x341   :  { %1279 = vmatmul.mubr.bf16.gmra.mrb[88].mxu1 %v2905_v53 }
 0x342   :  { %1286 = vmatprep.mubr.bf16.mxu1 %v2907_v54 }
 0x349   :  { %1287 = vmatmul.mubr.bf16.gmra.mrb[92].mxu1 %v2911_v55 }
 0x3a4   :  { %v1168_v20 = vpop.f32.mrb[32].mxu1 }
 0x3a5   :  { %v1170_v24 = vpop.f32.mrb[33].mxu1 }
 0x3a6   :  { %v1171_v26 = vpop.f32.mrb[34].mxu1 }
 0x3a7   :  { %v1295_v27 = vpack.c.bf16 %v1171_v26, %v1168_v20  ;;  %v1173_v28 = vpop.f32.mrb[35].mxu1 }
 0x3a9   :  { %2299 = vmatprep.mubr.bf16.mxu0 %v1295_v27 }
 0x3ac   :  { %v1176_v29 = vpop.f32.mrb[36].mxu1 }
 0x3ad   :  { %v1178_v30 = vpop.f32.mrb[37].mxu1 }
 0x3ae   :  { %v1179_v31 = vpop.f32.mrb[38].mxu1 }
 0x3af   :  { %v1296_v32 = vpack.c.bf16 %v1179_v31, %v1176_v29  ;;  %v1181_v33 = vpop.f32.mrb[39].mxu1 }
 0x3b1   :  { %2300 = vmatmul.mubr.bf16.vlgmr.msra.gmra.mrb[64].mxu0 %v1296_v32 }
 0x3b4   :  { %v1184_v34 = vpop.f32.mrb[40].mxu1 }
 0x3b5   :  { %v1186_v35 = vpop.f32.mrb[41].mxu1 }
 0x3b6   :  { %v1187_v36 = vpop.f32.mrb[42].mxu1 }
 0x3b7   :  { %v1297_v37 = vpack.c.bf16 %v1187_v36, %v1184_v34  ;;  %v1189_v38 = vpop.f32.mrb[43].mxu1 }
 0x3b9   :  { %2303 = vmatprep.mubr.bf16.mxu0 %v1297_v37 }
 0x3bc   :  { %v1192_v39 = vpop.f32.mrb[44].mxu1 }
 0x3bd   :  { %v1194_v40 = vpop.f32.mrb[45].mxu1 }
 0x3be   :  { %v1195_v41 = vpop.f32.mrb[46].mxu1 }
 0x3bf   :  { %v1298_v42 = vpack.c.bf16 %v1195_v41, %v1192_v39  ;;  %v1197_v44 = vpop.f32.mrb[47].mxu1  ;;  %v2997_v41 = vld [vmem:[#allocation9] sm:$0xff] }
 0x3c0   :  { %v3004_v44 = vld [vmem:[%s3084_s5] ss:$0 sm:$0xff] }
 0x3c1   :  { %2304 = vmatmul.mubr.bf16.gmra.mrb[68].mxu0 %v1298_v42  ;;  %v2038_v42 = vcombine.high %v2997_v41, %v2997_v41 }
 0x3c4   :  { %v1200_v45 = vpop.f32.mrb[48].mxu1 }
 0x3c5   :  { %v1202_v48 = vpop.f32.mrb[49].mxu1 }
 0x3c6   :  { %v1203_v49 = vpop.f32.mrb[50].mxu1  ;;  %v2657_v48 = vmov 0.0  }
 0x3c7   :  { %v1299_v51 = vpack.c.bf16 %v1203_v49, %v1200_v45  ;;  %v1205_v52 = vpop.f32.mrb[51].mxu1  ;;  %v2467_v45 = vld [vmem:[#allocation10] sm:$0xff]   ;;  %2331 = vmatprep.subr.bf16.mxu1 %v2657_v48 }
 0x3c8   :  { %2332 = vmatpush3.bf16.msra.mxu1 %v2467_v45 }
 0x3c9   :  { %2307 = vmatprep.mubr.bf16.mxu0 %v1299_v51  ;;  %v2468_v51 = vld [vmem:[#allocation10 + $0x8] sm:$0xff]   ;;  %2333 = vmatprep.subr.bf16.mxu1 %v2657_v48 }
 0x3cc   :  { %v1208_v53 = vpop.f32.mrb[52].mxu1  ;;  %2334 = vmatpush3.bf16.msra.mxu1 %v2468_v51 }
 0x3cd   :  { %v1210_v54 = vpop.f32.mrb[53].mxu1  ;;  %2335 = vmatprep.subr.bf16.mxu1 %v2657_v48 }
 0x3ce   :  { %v1211_v55 = vpop.f32.mrb[54].mxu1 }
 0x3cf   :  { %v1300_v59 = vpack.c.bf16 %v1211_v55, %v1208_v53  ;;  %v1213_v60 = vpop.f32.mrb[55].mxu1 }
 0x3d1   :  { %2308 = vmatmul.mubr.bf16.gmra.mrb[72].mxu0 %v1300_v59 }
 0x3d4   :  { %v1216_v61 = vpop.f32.mrb[56].mxu1 }
 0x3d5   :  { %v1218_v62 = vpop.f32.mrb[57].mxu1 }
 0x3d6   :  { %v1219_v63 = vpop.f32.mrb[58].mxu1 }
 0x3d7   :  { %v1301_v0 = vpack.c.bf16 %v1219_v63, %v1216_v61  ;;  %v1221_v1 = vpop.f32.mrb[59].mxu1 }
 0x3d9   :  { %2311 = vmatprep.mubr.bf16.mxu0 %v1301_v0  ;;  %v2469_v0 = vld [vmem:[#allocation10 + $0x10] sm:$0xff]  }
 0x3da   :  { %2336 = vmatpush3.bf16.msra.mxu1 %v2469_v0 }
 0x3db   :  { %2337 = vmatprep.subr.bf16.mxu1 %v2657_v48 }
 0x3dc   :  { %v1224_v2 = vpop.f32.mrb[60].mxu1 }
 0x3dd   :  { %v1226_v3 = vpop.f32.mrb[61].mxu1 }
 0x3de   :  { %v1227_v4 = vpop.f32.mrb[62].mxu1 }
 0x3df   :  { %v1302_v5 = vpack.c.bf16 %v1227_v4, %v1224_v2  ;;  %v1229_v6 = vpop.f32.mrb[63].mxu1 }
 0x3e1   :  { %2312 = vmatmul.mubr.bf16.gmra.mrb[76].mxu0 %v1302_v5 }
 0x3e4   :  { %v1232_v7 = vpop.f32.mrb[64].mxu1 }
 0x3e5   :  { %v1234_v8 = vpop.f32.mrb[65].mxu1 }
 0x3e6   :  { %v1235_v10 = vpop.f32.mrb[66].mxu1  ;;  %v2470_v8 = vld [vmem:[#allocation10 + $0x18] sm:$0xff]  }
 0x3e7   :  { %v1303_v12 = vpack.c.bf16 %v1235_v10, %v1232_v7  ;;  %v1237_v13 = vpop.f32.mrb[67].mxu1  ;;  %2338 = vmatpush3.bf16.msra.mxu1 %v2470_v8 }
 0x3e8   :  { %2339 = vmatprep.subr.bf16.mxu1 %v2657_v48 }
 0x3e9   :  { %2315 = vmatprep.mubr.bf16.mxu0 %v1303_v12  ;;  %v2471_v12 = vld [vmem:[#allocation10 + $0x20] sm:$0xff]  }
 0x3eb   :  { %2340 = vmatpush3.bf16.msra.mxu1 %v2471_v12 }
 0x3ec   :  { %v1240_v14 = vpop.f32.mrb[68].mxu1  ;;  %2341 = vmatprep.subr.bf16.mxu1 %v2657_v48 }
 0x3ed   :  { %v1242_v15 = vpop.f32.mrb[69].mxu1 }
 0x3ee   :  { %v1243_v16 = vpop.f32.mrb[70].mxu1 }
 0x3ef   :  { %v1304_v21 = vpack.c.bf16 %v1243_v16, %v1240_v14  ;;  %v1245_v22 = vpop.f32.mrb[71].mxu1  ;;  %v2472_v14 = vld [vmem:[#allocation10 + $0x28] sm:$0xff]  }
 0x3f0   :  { %2342 = vmatpush3.bf16.msra.mxu1 %v2472_v14 }
 0x3f1   :  { %2316 = vmatmul.mubr.bf16.gmra.mrb[80].mxu0 %v1304_v21  ;;  %2343 = vmatprep.subr.bf16.mxu1 %v2657_v48 }
 0x3f4   :  { %v1248_v23 = vpop.f32.mrb[72].mxu1 }
 0x3f5   :  { %v1250_v11 = vpop.f32.mrb[73].mxu1 }
 0x3f6   :  { %v1251_v25 = vpop.f32.mrb[74].mxu1 }
 0x3f7   :  { %v1305_v43 = vpack.c.bf16 %v1251_v25, %v1248_v23  ;;  %v1253_v46 = vpop.f32.mrb[75].mxu1 }
 0x3f9   :  { %2319 = vmatprep.mubr.bf16.mxu0 %v1305_v43 }
 0x3fc   :  { %v1256_v47 = vpop.f32.mrb[76].mxu1 }
 0x3fd   :  { %v1258_v50 = vpop.f32.mrb[77].mxu1 }
 0x3fe   :  { %v1259_v56 = vpop.f32.mrb[78].mxu1 }
 0x3ff   :  { %v1306_v58 = vpack.c.bf16 %v1259_v56, %v1256_v47  ;;  %v1261_v9 = vpop.f32.mrb[79].mxu1  ;;  %v2473_v47 = vld [vmem:[#allocation10 + $0x30] sm:$0xff]  }
 0x400   :  { %2344 = vmatpush3.bf16.msra.mxu1 %v2473_v47 }
 0x401   :  { %2320 = vmatmul.mubr.bf16.gmra.mrb[84].mxu0 %v1306_v58  ;;  %2345 = vmatprep.subr.bf16.mxu1 %v2657_v48 }
 0x404   :  { %v1264_v17 = vpop.f32.mrb[80].mxu1 }
 0x405   :  { %v1266_v18 = vpop.f32.mrb[81].mxu1 }
 0x406   :  { %v1267_v19 = vpop.f32.mrb[82].mxu1 }
 0x407   :  { %v1307_v20 = vpack.c.bf16 %v1267_v19, %v1264_v17  ;;  %v1269_v24 = vpop.f32.mrb[83].mxu1 }
 0x409   :  { %2323 = vmatprep.mubr.bf16.mxu0 %v1307_v20  ;;  %v2474_v20 = vld [vmem:[#allocation10 + $0x38] sm:$0xff]  }
 0x40a   :  { %2346 = vmatpush3.bf16.msra.mxu1 %v2474_v20 }
 0x40c   :  { %v1272_v26 = vpop.f32.mrb[84].mxu1 }
 0x40d   :  { %v1274_v27 = vpop.f32.mrb[85].mxu1 }
 0x40e   :  { %v1275_v28 = vpop.f32.mrb[86].mxu1 }
 0x40f   :  { %v1308_v29 = vpack.c.bf16 %v1275_v28, %v1272_v26  ;;  %v1277_v30 = vpop.f32.mrb[87].mxu1 }
 0x411   :  { %2324 = vmatmul.mubr.bf16.gmra.mrb[88].mxu0 %v1308_v29 }
 0x414   :  { %v1280_v31 = vpop.f32.mrb[88].mxu1 }
 0x415   :  { %v1282_v32 = vpop.f32.mrb[89].mxu1 }
 0x416   :  { %v1283_v33 = vpop.f32.mrb[90].mxu1 }
 0x417   :  { %v1309_v34 = vpack.c.bf16 %v1283_v33, %v1280_v31  ;;  %v1285_v35 = vpop.f32.mrb[91].mxu1 }
 0x419   :  { %2327 = vmatprep.mubr.bf16.mxu0 %v1309_v34 }
 0x41c   :  { %v1288_v36 = vpop.f32.mrb[92].mxu1 }
 0x41d   :  { %v1290_v37 = vpop.f32.mrb[93].mxu1 }
 0x41e   :  { %v1291_v38 = vpop.f32.mrb[94].mxu1 }
 0x41f   :  { %v1310_v39 = vpack.c.bf16 %v1291_v38, %v1288_v36  ;;  %v1293_v40 = vpop.f32.mrb[95].mxu1 }
 0x421   :  { %2328 = vmatmul.mubr.bf16.gmra.mrb[92].mxu0 %v1310_v39 }
 0x422   :  { %1727 = vmatprep.mubr.bf16.mxu0 %v2038_v42 }
 0x484   :  { %v2301_v49 = vpop.f32.mrb[64].mxu0 }
 0x485   :  { %v1425_v52 = vadd.f32 %v2301_v49, %v3004_v44  ;;  %v1416_v53 = vpop.f32.mrb[65].mxu0 }
 0x486   :  { %v1417_v54 = vadd.f32 %v3004_v44, %v1416_v53  ;;  %v2302_v55 = vpop.f32.mrb[66].mxu0 }
 0x487   :  { %v1577_v59 = vmul.f32 0.2, %v1425_v52  ;;  %v1428_v60 = vadd.f32 %v2302_v55, %v3004_v44  ;;  %v1419_v61 = vpop.f32.mrb[67].mxu0  ;;  %vm1545_vm14 = vcmp.gt.f32.partialorder %v1425_v52, 0.0 }
 0x488   :  { %v1575_v62 = vmul.f32 0.2, %v1417_v54  ;;  %v1420_v63 = vadd.f32 %v3004_v44, %v1419_v61  ;;  %vm1543_vm15 = vcmp.gt.f32.partialorder %v1417_v54, 0.0 }
 0x489   :  { %vm1546_vm0 = vcmp.gt.f32.partialorder %v1428_v60, 0.0  ;;  %v1578_v1 = vmul.f32 0.2, %v1428_v60  ;;  %v1609_v3 = vsel %vm1545_vm14, %v1425_v52, %v1577_v59 }
 0x48a   :  { %vm1544_vm1 = vcmp.gt.f32.partialorder %v1420_v63, 0.0  ;;  %v1576_v2 = vmul.f32 0.2, %v1420_v63  ;;  %v1607_v5 = vsel %vm1543_vm15, %v1417_v54, %v1575_v62 }
 0x48b   :  { %v1610_v4 = vsel %vm1546_vm0, %v1428_v60, %v1578_v1 }
 0x48c   :  { %v1672_v6 = vpack.c.bf16 %v1610_v4, %v1609_v3  ;;  %v1608_v7 = vsel %vm1544_vm1, %v1420_v63, %v1576_v2 }
 0x48d   :  { %v1671_v10 = vpack.c.bf16 %v1608_v7, %v1607_v5 }
 0x48f   :  { %1696 = vmatpush1.bf16.msra.mxu0 %v1671_v10 }
 0x490   :  { %1697 = vmatprep.subr.bf16.mxu0 %v2656_v57 }
 0x493   :  { %1698 = vmatpush1.bf16.msra.mxu0 %v1672_v6 }
 0x494   :  { %v2305_v13 = vpop.f32.mrb[68].mxu0  ;;  %1699 = vmatprep.subr.bf16.mxu0 %v2656_v57 }
 0x495   :  { %v1441_v15 = vadd.f32 %v2305_v13, %v3004_v44  ;;  %v1432_v16 = vpop.f32.mrb[69].mxu0 }
 0x496   :  { %v1433_v21 = vadd.f32 %v3004_v44, %v1432_v16  ;;  %v2306_v22 = vpop.f32.mrb[70].mxu0 }
 0x497   :  { %v1581_v23 = vmul.f32 0.2, %v1441_v15  ;;  %v1444_v11 = vadd.f32 %v2306_v22, %v3004_v44  ;;  %v1435_v25 = vpop.f32.mrb[71].mxu0  ;;  %vm1549_vm2 = vcmp.gt.f32.partialorder %v1441_v15, 0.0 }
 0x498   :  { %v1579_v43 = vmul.f32 0.2, %v1433_v21  ;;  %v1436_v46 = vadd.f32 %v3004_v44, %v1435_v25  ;;  %vm1547_vm3 = vcmp.gt.f32.partialorder %v1433_v21, 0.0 }
 0x499   :  { %vm1550_vm4 = vcmp.gt.f32.partialorder %v1444_v11, 0.0  ;;  %v1582_v50 = vmul.f32 0.2, %v1444_v11  ;;  %v1613_v58 = vsel %vm1549_vm2, %v1441_v15, %v1581_v23 }
 0x49a   :  { %vm1548_vm5 = vcmp.gt.f32.partialorder %v1436_v46, 0.0  ;;  %v1580_v56 = vmul.f32 0.2, %v1436_v46  ;;  %v1611_v17 = vsel %vm1547_vm3, %v1433_v21, %v1579_v43 }
 0x49b   :  { %v1614_v9 = vsel %vm1550_vm4, %v1444_v11, %v1582_v50 }
 0x49c   :  { %v1674_v18 = vpack.c.bf16 %v1614_v9, %v1613_v58  ;;  %v1612_v19 = vsel %vm1548_vm5, %v1436_v46, %v1580_v56 }
 0x49d   :  { %v1673_v24 = vpack.c.bf16 %v1612_v19, %v1611_v17 }
 0x49f   :  { %1700 = vmatpush1.bf16.msra.mxu0 %v1673_v24 }
 0x4a0   :  { %1701 = vmatprep.subr.bf16.mxu0 %v2656_v57 }
 0x4a3   :  { %1702 = vmatpush1.bf16.msra.mxu0 %v1674_v18 }
 0x4a4   :  { %v2309_v26 = vpop.f32.mrb[72].mxu0  ;;  %1703 = vmatprep.subr.bf16.mxu0 %v2656_v57 }
 0x4a5   :  { %v1457_v27 = vadd.f32 %v2309_v26, %v3004_v44  ;;  %v1448_v28 = vpop.f32.mrb[73].mxu0 }
 0x4a6   :  { %v1449_v29 = vadd.f32 %v3004_v44, %v1448_v28  ;;  %v2310_v30 = vpop.f32.mrb[74].mxu0 }
 0x4a7   :  { %v1585_v31 = vmul.f32 0.2, %v1457_v27  ;;  %v1460_v32 = vadd.f32 %v2310_v30, %v3004_v44  ;;  %v1451_v33 = vpop.f32.mrb[75].mxu0  ;;  %vm1553_vm6 = vcmp.gt.f32.partialorder %v1457_v27, 0.0 }
 0x4a8   :  { %v1583_v34 = vmul.f32 0.2, %v1449_v29  ;;  %v1452_v35 = vadd.f32 %v3004_v44, %v1451_v33  ;;  %vm1551_vm7 = vcmp.gt.f32.partialorder %v1449_v29, 0.0 }
 0x4a9   :  { %vm1554_vm8 = vcmp.gt.f32.partialorder %v1460_v32, 0.0  ;;  %v1586_v36 = vmul.f32 0.2, %v1460_v32  ;;  %v1617_v38 = vsel %vm1553_vm6, %v1457_v27, %v1585_v31 }
 0x4aa   :  { %vm1552_vm9 = vcmp.gt.f32.partialorder %v1452_v35, 0.0  ;;  %v1584_v37 = vmul.f32 0.2, %v1452_v35  ;;  %v1615_v40 = vsel %vm1551_vm7, %v1449_v29, %v1583_v34 }
 0x4ab   :  { %v1618_v39 = vsel %vm1554_vm8, %v1460_v32, %v1586_v36 }
 0x4ac   :  { %v1676_v42 = vpack.c.bf16 %v1618_v39, %v1617_v38  ;;  %v1616_v45 = vsel %vm1552_vm9, %v1452_v35, %v1584_v37 }
 0x4ad   :  { %v1675_v49 = vpack.c.bf16 %v1616_v45, %v1615_v40 }
 0x4af   :  { %1704 = vmatpush1.bf16.msra.mxu0 %v1675_v49 }
 0x4b0   :  { %1705 = vmatprep.subr.bf16.mxu0 %v2656_v57 }
 0x4b3   :  { %1706 = vmatpush1.bf16.msra.mxu0 %v1676_v42 }
 0x4b4   :  { %v2313_v51 = vpop.f32.mrb[76].mxu0  ;;  %1707 = vmatprep.subr.bf16.mxu0 %v2656_v57 }
 0x4b5   :  { %v1473_v52 = vadd.f32 %v2313_v51, %v3004_v44  ;;  %v1464_v53 = vpop.f32.mrb[77].mxu0 }
 0x4b6   :  { %v1465_v54 = vadd.f32 %v3004_v44, %v1464_v53  ;;  %v2314_v55 = vpop.f32.mrb[78].mxu0 }
 0x4b7   :  { %v1589_v59 = vmul.f32 0.2, %v1473_v52  ;;  %v1476_v60 = vadd.f32 %v2314_v55, %v3004_v44  ;;  %v1467_v61 = vpop.f32.mrb[79].mxu0  ;;  %vm1557_vm10 = vcmp.gt.f32.partialorder %v1473_v52, 0.0 }
 0x4b8   :  { %v1587_v62 = vmul.f32 0.2, %v1465_v54  ;;  %v1468_v63 = vadd.f32 %v3004_v44, %v1467_v61  ;;  %vm1555_vm11 = vcmp.gt.f32.partialorder %v1465_v54, 0.0 }
 0x4b9   :  { %vm1558_vm12 = vcmp.gt.f32.partialorder %v1476_v60, 0.0  ;;  %v1590_v0 = vmul.f32 0.2, %v1476_v60  ;;  %v1621_v2 = vsel %vm1557_vm10, %v1473_v52, %v1589_v59 }
 0x4ba   :  { %vm1556_vm13 = vcmp.gt.f32.partialorder %v1468_v63, 0.0  ;;  %v1588_v1 = vmul.f32 0.2, %v1468_v63  ;;  %v1619_v4 = vsel %vm1555_vm11, %v1465_v54, %v1587_v62 }
 0x4bb   :  { %v1622_v3 = vsel %vm1558_vm12, %v1476_v60, %v1590_v0  ;;  %vm2658_vm12 = vmmov 0  }
 0x4bc   :  { %v1678_v5 = vpack.c.bf16 %v1622_v3, %v1621_v2  ;;  %v1620_v6 = vsel %vm1556_vm13, %v1468_v63, %v1588_v1  ;;  %2347 = vmatprep.mubr.msk.bf16.mxu1 %vm2658_vm12, %v2657_v48 }
 0x4bd   :  { %v1677_v7 = vpack.c.bf16 %v1620_v6, %v1619_v4 }
 0x4bf   :  { %1708 = vmatpush1.bf16.msra.mxu0 %v1677_v7 }
 0x4c0   :  { %1709 = vmatprep.subr.bf16.mxu0 %v2656_v57 }
 0x4c3   :  { %1710 = vmatpush1.bf16.msra.mxu0 %v1678_v5 }
 0x4c4   :  { %v2317_v8 = vpop.f32.mrb[80].mxu0  ;;  %1711 = vmatprep.subr.bf16.mxu0 %v2656_v57 }
 0x4c5   :  { %v1489_v10 = vadd.f32 %v2317_v8, %v3004_v44  ;;  %v1480_v12 = vpop.f32.mrb[81].mxu0 }
 0x4c6   :  { %v1481_v13 = vadd.f32 %v3004_v44, %v1480_v12  ;;  %v2318_v14 = vpop.f32.mrb[82].mxu0 }
 0x4c7   :  { %v1593_v15 = vmul.f32 0.2, %v1489_v10  ;;  %v1492_v16 = vadd.f32 %v2318_v14, %v3004_v44  ;;  %v1483_v21 = vpop.f32.mrb[83].mxu0  ;;  %vm1561_vm14 = vcmp.gt.f32.partialorder %v1489_v10, 0.0 }
 0x4c8   :  { %v1591_v22 = vmul.f32 0.2, %v1481_v13  ;;  %v1484_v23 = vadd.f32 %v3004_v44, %v1483_v21  ;;  %vm1559_vm15 = vcmp.gt.f32.partialorder %v1481_v13, 0.0  ;;  %v2479_v21 = vld [vmem:[#allocation12 + $0x20] sm:$0xff]  }
 0x4c9   :  { %vm1562_vm0 = vcmp.gt.f32.partialorder %v1492_v16, 0.0  ;;  %v1594_v11 = vmul.f32 0.2, %v1492_v16  ;;  %v1625_v43 = vsel %vm1561_vm14, %v1489_v10, %v1593_v15  ;;  %v2037_v15 = vcombine.low %v2997_v41, %v2997_v41  ;;  %v2478_v41 = vld [vmem:[#allocation12 + $0x18] sm:$0xff]  }
 0x4ca   :  { %vm1560_vm1 = vcmp.gt.f32.partialorder %v1484_v23, 0.0  ;;  %v1592_v25 = vmul.f32 0.2, %v1484_v23  ;;  %v1623_v47 = vsel %vm1559_vm15, %v1481_v13, %v1591_v22  ;;  %v2480_v22 = vld [vmem:[#allocation12 + $0x28] sm:$0xff]  }
 0x4cb   :  { %v1626_v46 = vsel %vm1562_vm0, %v1492_v16, %v1594_v11  ;;  %v2477_v16 = vld [vmem:[#allocation12 + $0x10] sm:$0xff]  }
 0x4cc   :  { %v1680_v50 = vpack.c.bf16 %v1626_v46, %v1625_v43  ;;  %v1624_v56 = vsel %vm1560_vm1, %v1484_v23, %v1592_v25 }
 0x4cd   :  { %v1679_v58 = vpack.c.bf16 %v1624_v56, %v1623_v47  ;;  %v2481_v47 = vld [vmem:[#allocation12 + $0x30] sm:$0xff]   ;;  %v2039_v56 = vld [vmem:[%s3087_s8] ss:$0 sm:$0xff] }
 0x4cf   :  { %1712 = vmatpush1.bf16.msra.mxu0 %v1679_v58 }
 0x4d0   :  { %1713 = vmatprep.subr.bf16.mxu0 %v2656_v57 }
 0x4d3   :  { %1714 = vmatpush1.bf16.msra.mxu0 %v1680_v50  ;;  %v2482_v50 = vld [vmem:[#allocation12 + $0x38] sm:$0xff]  }
 0x4d4   :  { %v2321_v9 = vpop.f32.mrb[84].mxu0  ;;  %1715 = vmatprep.subr.bf16.mxu0 %v2656_v57 }
 0x4d5   :  { %v1505_v17 = vadd.f32 %v2321_v9, %v3004_v44  ;;  %v1496_v18 = vpop.f32.mrb[85].mxu0 }
 0x4d6   :  { %v1497_v19 = vadd.f32 %v3004_v44, %v1496_v18  ;;  %v2322_v20 = vpop.f32.mrb[86].mxu0 }
 0x4d7   :  { %v1597_v24 = vmul.f32 0.2, %v1505_v17  ;;  %v1508_v26 = vadd.f32 %v2322_v20, %v3004_v44  ;;  %v1499_v27 = vpop.f32.mrb[87].mxu0  ;;  %vm1565_vm2 = vcmp.gt.f32.partialorder %v1505_v17, 0.0 }
 0x4d8   :  { %v1595_v28 = vmul.f32 0.2, %v1497_v19  ;;  %v1500_v29 = vadd.f32 %v3004_v44, %v1499_v27  ;;  %vm1563_vm3 = vcmp.gt.f32.partialorder %v1497_v19, 0.0 }
 0x4d9   :  { %vm1566_vm4 = vcmp.gt.f32.partialorder %v1508_v26, 0.0  ;;  %v1598_v30 = vmul.f32 0.2, %v1508_v26  ;;  %v1629_v32 = vsel %vm1565_vm2, %v1505_v17, %v1597_v24 }
 0x4da   :  { %vm1564_vm5 = vcmp.gt.f32.partialorder %v1500_v29, 0.0  ;;  %v1596_v31 = vmul.f32 0.2, %v1500_v29  ;;  %v1627_v34 = vsel %vm1563_vm3, %v1497_v19, %v1595_v28 }
 0x4db   :  { %v1630_v33 = vsel %vm1566_vm4, %v1508_v26, %v1598_v30 }
 0x4dc   :  { %v1682_v35 = vpack.c.bf16 %v1630_v33, %v1629_v32  ;;  %v1628_v36 = vsel %vm1564_vm5, %v1500_v29, %v1596_v31 }
 0x4dd   :  { %v1681_v37 = vpack.c.bf16 %v1628_v36, %v1627_v34 }
 0x4df   :  { %1716 = vmatpush1.bf16.msra.mxu0 %v1681_v37 }
 0x4e0   :  { %1717 = vmatprep.subr.bf16.mxu0 %v2656_v57 }
 0x4e3   :  { %1718 = vmatpush1.bf16.msra.mxu0 %v1682_v35 }
 0x4e4   :  { %v2325_v38 = vpop.f32.mrb[88].mxu0  ;;  %1719 = vmatprep.subr.bf16.mxu0 %v2656_v57 }
 0x4e5   :  { %v1521_v39 = vadd.f32 %v2325_v38, %v3004_v44  ;;  %v1512_v40 = vpop.f32.mrb[89].mxu0 }
 0x4e6   :  { %v1513_v42 = vadd.f32 %v3004_v44, %v1512_v40  ;;  %v2326_v45 = vpop.f32.mrb[90].mxu0 }
 0x4e7   :  { %v1601_v49 = vmul.f32 0.2, %v1521_v39  ;;  %v1524_v51 = vadd.f32 %v2326_v45, %v3004_v44  ;;  %v1515_v52 = vpop.f32.mrb[91].mxu0  ;;  %vm1569_vm6 = vcmp.gt.f32.partialorder %v1521_v39, 0.0 }
 0x4e8   :  { %v1599_v53 = vmul.f32 0.2, %v1513_v42  ;;  %v1516_v54 = vadd.f32 %v3004_v44, %v1515_v52  ;;  %vm1567_vm7 = vcmp.gt.f32.partialorder %v1513_v42, 0.0 }
 0x4e9   :  { %vm1570_vm8 = vcmp.gt.f32.partialorder %v1524_v51, 0.0  ;;  %v1602_v55 = vmul.f32 0.2, %v1524_v51  ;;  %v1633_v60 = vsel %vm1569_vm6, %v1521_v39, %v1601_v49 }
 0x4ea   :  { %vm1568_vm9 = vcmp.gt.f32.partialorder %v1516_v54, 0.0  ;;  %v1600_v59 = vmul.f32 0.2, %v1516_v54  ;;  %v1631_v62 = vsel %vm1567_vm7, %v1513_v42, %v1599_v53 }
 0x4eb   :  { %v1634_v61 = vsel %vm1570_vm8, %v1524_v51, %v1602_v55 }
 0x4ec   :  { %v1684_v63 = vpack.c.bf16 %v1634_v61, %v1633_v60  ;;  %v1632_v0 = vsel %vm1568_vm9, %v1516_v54, %v1600_v59 }
 0x4ed   :  { %v1683_v1 = vpack.c.bf16 %v1632_v0, %v1631_v62 }
 0x4ef   :  { %1720 = vmatpush1.bf16.msra.mxu0 %v1683_v1 }
 0x4f0   :  { %1721 = vmatprep.subr.bf16.mxu0 %v2656_v57 }
 0x4f3   :  { %1722 = vmatpush1.bf16.msra.mxu0 %v1684_v63 }
 0x4f4   :  { %v2329_v2 = vpop.f32.mrb[92].mxu0  ;;  %1723 = vmatprep.subr.bf16.mxu0 %v2656_v57  ;;  %v2475_v57 = vld [vmem:[#allocation12] sm:$0xff]  }
 0x4f5   :  { %v1528_v3 = vpop.f32.mrb[93].mxu0 }
 0x4f6   :  { %v1529_v4 = vadd.f32 %v3004_v44, %v1528_v3  ;;  %v2330_v5 = vpop.f32.mrb[94].mxu0 }
 0x4f7   :  { %v1531_v6 = vpop.f32.mrb[95].mxu0 }
 0x4f8   :  { %v1603_v7 = vmul.f32 0.2, %v1529_v4  ;;  %v1532_v8 = vadd.f32 %v3004_v44, %v1531_v6  ;;  %vm1571_vm10 = vcmp.gt.f32.partialorder %v1529_v4, 0.0  ;;  %v2476_v44 = vld [vmem:[#allocation12 + $0x8] sm:$0xff]  }
 0x4fa   :  { %vm1572_vm11 = vcmp.gt.f32.partialorder %v1532_v8, 0.0  ;;  %v1604_v10 = vmul.f32 0.2, %v1532_v8  ;;  %v1635_v12 = vsel %vm1571_vm10, %v1529_v4, %v1603_v7 }
 0x4fc   :  { %v1636_v13 = vsel %vm1572_vm11, %v1532_v8, %v1604_v10 }
 0x4fd   :  { %v1685_v14 = vpack.c.bf16 %v1636_v13, %v1635_v12 }
 0x4ff   :  { %1724 = vmatpush1.bf16.msra.mxu0 %v1685_v14 }
 0x500   :  { %2351 = vmatprep.subr.bf16.mxu0 %v2657_v48 }
 0x502   :  { %1728 = vmatmul.mubr.bf16.vlgmr.msra.gmra.mrb[96].mxu0 %v2037_v15 }
 0x503   :  { %2367 = vmatprep.mubr.msk.bf16.mxu0 %vm2658_vm12, %v2657_v48  ;;  %2352 = vmatpush3.bf16.msra.mxu0 %v2475_v57 }
 0x504   :  { %2353 = vmatprep.subr.bf16.mxu0 %v2657_v48 }
 0x507   :  { %2354 = vmatpush3.bf16.msra.mxu0 %v2476_v44 }
 0x508   :  { %2355 = vmatprep.subr.bf16.mxu0 %v2657_v48 }
 0x50b   :  { %2356 = vmatpush3.bf16.msra.mxu0 %v2477_v16 }
 0x50c   :  { %2357 = vmatprep.subr.bf16.mxu0 %v2657_v48 }
 0x50f   :  { %2358 = vmatpush3.bf16.msra.mxu0 %v2478_v41 }
 0x510   :  { %2359 = vmatprep.subr.bf16.mxu0 %v2657_v48 }
 0x513   :  { %2360 = vmatpush3.bf16.msra.mxu0 %v2479_v21 }
 0x514   :  { %2361 = vmatprep.subr.bf16.mxu0 %v2657_v48 }
 0x517   :  { %2362 = vmatpush3.bf16.msra.mxu0 %v2480_v22 }
 0x518   :  { %2363 = vmatprep.subr.bf16.mxu0 %v2657_v48 }
 0x51b   :  { %2364 = vmatpush3.bf16.msra.mxu0 %v2481_v47 }
 0x51c   :  { %2365 = vmatprep.subr.bf16.mxu0 %v2657_v48  ;;  %v2048_v48 = vld [vmem:[%s3089_s10] ss:$0 sm:$0xff] }
 0x51f   :  { %2366 = vmatpush3.bf16.msra.mxu0 %v2482_v50 }
 0x5d5   :  { %v1729_v23 = vpop.f32.mrb[96].mxu0 }
 0x5d6   :  { %v1735_v11 = vpack.c.bf16 %v1729_v23, %v1729_v23  ;;  %v1731_v25 = vpop.f32.mrb[97].mxu0 }
 0x5d7   :  { %v1732_v43 = vpop.f32.mrb[98].mxu0 }
 0x5d8   :  { %v1733_v46 = vpop.f32.mrb[99].mxu0  ;;  %2348 = vmatmul.mubr.bf16.vlgmr.msra.gmra.mrb[96].mxu1 %v1735_v11 }
 0x6ab   :  { %v1841_v58 = vpop.f32.mrb[96].mxu1 }
 0x6ac   :  { %v1842_v9 = vadd.f32 %v2039_v56, %v1841_v58  ;;  %v2349_v17 = vpop.f32.mrb[97].mxu1 }
 0x6ad   :  { %v1844_v18 = vpop.f32.mrb[98].mxu1 }
 0x6ae   :  { %vm1847_vm13 = vcmp.gt.f32.partialorder %v1842_v9, 0.0  ;;  %v1848_v19 = vmul.f32 0.2, %v1842_v9  ;;  %v2350_v20 = vpop.f32.mrb[99].mxu1 }
 0x6b0   :  { %v1849_v24 = vsel %vm1847_vm13, %v1842_v9, %v1848_v19 }
 0x6b1   :  { %v1850_v26 = vpack.c.bf16 %v1849_v24, %v1849_v24 }
 0x6b3   :  { %2368 = vmatmul.mubr.bf16.vlgmr.msra.gmra.mrb[100].mxu0 %v1850_v26 }
 0x786   :  { %v1956_v27 = vpop.f32.mrb[100].mxu0 }
 0x787   :  { %v1957_v28 = vadd.f32 %v2048_v48, %v1956_v27  ;;  %v2369_v29 = vpop.f32.mrb[101].mxu0 }
 0x788   :  { %v1959_v30 = vpop.f32.mrb[102].mxu0 }
 0x789   :  { %1962 = vst [vmem:[%s3090_s11] sm:$0xff] %v1957_v28  ;;  %v2370_v31 = vpop.f32.mrb[103].mxu0 }
 0x78a   :  { %1967 = vsyncpa [#allocation3], 1 }
 0x78b   :  { %1968 = vsyncpa [#allocation5], 1 }
 0x78c   :  { %1969 = vsyncpa [#allocation8], 1 }
 0x78d   :  { %1970 = vsyncpa [#allocation11], 1 }

</bundles_post_ra>
